<compile_context>
chip_gen: v7x
topology: tpu7x:2x2x1
jax: 0.10.0
libtpu: 0.0.40
codegen_flags: <defaults>
</compile_context>

<pallas_src>
import functools
import math

import jax
import jax.numpy as jnp
from jax.experimental import pallas as pl
from jax.experimental.pallas import tpu as pltpu

LN_EPS = 1e-12
ROW_TILE = 512          # rows (B*T) per grid step for row-tiled kernels (multiple of 8)
Q_TILE = 256            # query rows per attention grid step (multiple of 8)
DFF_CHUNK = 512         # FFN hidden chunk: bounds the live (tm, chunk) f32 ReLU tile


# ----------------------------------------------------------------------------
# hardware-aware knobs
# ----------------------------------------------------------------------------
def _pick_vmem_limit():
    """Generation-aware scoped-VMEM ceiling (v7x: 64 MiB physical; v5e/v6e: 128 MiB)."""
    try:
        cap = int(pltpu.get_tpu_info().vmem_capacity_bytes)
    except Exception:
        return 48 * 1024 * 1024                       # conservative fallback
    if cap >= 96 * 1024 * 1024:                       # v5e / v6e class
        return 96 * 1024 * 1024
    return min(40 * 1024 * 1024, cap * 5 // 8)        # v7x class


VMEM_LIMIT = _pick_vmem_limit()

_SINGLE_BUFFER_OK = None


def _supports_single_buffered_consts():
    """Probe once whether pipeline_mode=pl.Buffered(1) works for constant blocks."""
    global _SINGLE_BUFFER_OK
    if _SINGLE_BUFFER_OK is not None:
        return _SINGLE_BUFFER_OK
    try:
        def _k(a_ref, c_ref, o_ref):
            o_ref[...] = a_ref[...] + c_ref[...]

        x = jnp.arange(8 * 128, dtype=jnp.float32).reshape(8, 128)
        stream = jnp.concatenate([x, x], axis=0)
        out = pl.pallas_call(
            _k,
            out_shape=jax.ShapeDtypeStruct((16, 128), jnp.float32),
            grid=(2,),
            in_specs=[pl.BlockSpec((8, 128), lambda i: (i, 0)),
                      pl.BlockSpec((8, 128), lambda i: (0, 0),
                                   pipeline_mode=pl.Buffered(1))],
            out_specs=pl.BlockSpec((8, 128), lambda i: (i, 0)),
        )(stream, x)
        jax.block_until_ready(out)
        _SINGLE_BUFFER_OK = bool(jnp.allclose(out, 2.0 * stream))
    except Exception:
        _SINGLE_BUFFER_OK = False
    return _SINGLE_BUFFER_OK


def _const_spec(shape):
    """BlockSpec for a grid-resident constant (weights / biases / LN params)."""
    ndim = len(shape)
    idx = lambda *_: (0,) * ndim
    if _supports_single_buffered_consts():
        # single-buffer resident constants: no 2x VMEM for blocks that never change
        return pl.BlockSpec(shape, idx, pipeline_mode=pl.Buffered(1))
    return pl.BlockSpec(shape, idx)


# ----------------------------------------------------------------------------
# Pallas kernels
# ----------------------------------------------------------------------------
def _matmul_bias_kernel(x_ref, w_ref, b_ref, o_ref, *, relu):
    """y = x @ w + b (optionally ReLU). bf16 MXU inputs, f32 accumulation."""
    y = jnp.dot(x_ref[...].astype(jnp.bfloat16), w_ref[...],
                preferred_element_type=jnp.float32) + b_ref[...]
    if relu:
        y = jnp.maximum(y, 0.0)
    o_ref[...] = y.astype(o_ref.dtype)


def _embed_kernel(x_ref, m_ref, pe_ref, w_ref, b_ref, o_ref, *, scale):
    """Linear + x*sqrt(d_model) + positional encoding + initial masked_fill, fused.
    PE is a resident (T, D) constant; mask is (T, 1)."""
    y = jnp.dot(x_ref[...].astype(jnp.bfloat16), w_ref[...],
                preferred_element_type=jnp.float32) + b_ref[...]
    y = y * scale + pe_ref[...]                       # pos_dropout_rate = 0 -> identity
    o_ref[...] = (y * m_ref[...]).astype(o_ref.dtype)


def _layernorm_kernel(x_ref, g_ref, b_ref, o_ref, *, eps):
    x = x_ref[...].astype(jnp.float32)
    mu = jnp.mean(x, axis=-1, keepdims=True)
    var = jnp.mean((x - mu) ** 2, axis=-1, keepdims=True)
    o_ref[...] = ((x - mu) * jax.lax.rsqrt(var + eps) * g_ref[...] + b_ref[...]
                  ).astype(o_ref.dtype)


def _ln_qkv_kernel(x_ref, g_ref, b_ref, w_ref, bias_ref, q_ref, k_ref, v_ref,
                   *, heads, eps):
    """Fused LayerNorm1 + QKV projection, emitting head-major (H, T, dk) Q/K/V blocks.
    Q is pre-scaled by 1/sqrt(dk) (folded into wqkv/bqkv).  The per-head lane-slice
    relayout happens once here (MXU-bound kernel, store/XLU slots have slack) instead of
    inside the attention core."""
    x = x_ref[...].astype(jnp.float32)
    mu = jnp.mean(x, axis=-1, keepdims=True)
    var = jnp.mean((x - mu) ** 2, axis=-1, keepdims=True)
    xn = (x - mu) * jax.lax.rsqrt(var + eps) * g_ref[...] + b_ref[...]
    y = jnp.dot(xn.astype(jnp.bfloat16), w_ref[...],
                preferred_element_type=jnp.float32) + bias_ref[...]
    d3 = y.shape[-1]
    d_model = d3 // 3
    dk = d_model // heads
    yb = y.astype(jnp.bfloat16)
    for h in range(heads):                            # static unroll
        q_ref[h, :, :] = yb[:, h * dk:(h + 1) * dk]
        k_ref[h, :, :] = yb[:, d_model + h * dk:d_model + (h + 1) * dk]
        v_ref[h, :, :] = yb[:, 2 * d_model + h * dk:2 * d_model + (h + 1) * dk]


def _attn_kernel(q_ref, k_ref, v_ref, m_ref, o_ref):
    """Attention core for one (batch, head, q-tile): q (tq, dk), k/v (T, dk), mask (1, T).
    Full key range is resident, so the softmax is exact; the score working set is (tq, T).
    # TODO(synk): add KV tiling with an online softmax if T grows beyond a few thousand
    # frames so the (T, dk) K/V blocks and (tq, T) scores stay within v7x VMEM budgets."""
    s = jax.lax.dot_general(q_ref[...], k_ref[...], (((1,), (1,)), ((), ())),
                            preferred_element_type=jnp.float32)   # (tq, T)
    valid = m_ref[...] > 0.5                          # (1, T) key mask, bcast over queries
    s = jnp.where(valid, s, jnp.finfo(jnp.float32).min)
    smax = jnp.max(s, axis=-1, keepdims=True)
    p = jnp.exp(s - smax)
    l = jnp.sum(p, axis=-1, keepdims=True)
    attn = p * pl.reciprocal(l, approx=True)          # EUP reciprocal (~1e-3 rel err)
    # post-softmax masked_fill(0.0) omitted: masked keys exponentiate to exactly 0;
    # fully-padded query rows are zeroed by the encoder-level mask multiply downstream.
    o_ref[...] = jnp.dot(attn.astype(jnp.bfloat16), v_ref[...],
                         preferred_element_type=jnp.float32).astype(o_ref.dtype)


def _attn_out_ffn_kernel(ctx_ref, res_ref, m_ref,
                         wo_ref, bo_ref, g2_ref, b2_ref,
                         w1_ref, b1_ref, w2_ref, b2f_ref,
                         o_ref, *, eps, dff_chunk):
    """Fused: head-merge + output-proj + residual + LayerNorm2 + chunked FFN
    (Linear-ReLU-Linear) + residual + encoder-level masked_fill.  Dropouts identities."""
    heads = ctx_ref.shape[0]
    # output projection directly from head-major ctx: sum_h ctx_h @ Wo_h  (no transpose)
    acc = None
    for h in range(heads):                            # static unroll
        part = jnp.dot(ctx_ref[h], wo_ref[h], preferred_element_type=jnp.float32)
        acc = part if acc is None else acc + part
    x1 = res_ref[...].astype(jnp.float32) + acc + bo_ref[...]     # residual add
    mu = jnp.mean(x1, axis=-1, keepdims=True)
    var = jnp.mean((x1 - mu) ** 2, axis=-1, keepdims=True)
    xn = ((x1 - mu) * jax.lax.rsqrt(var + eps) * g2_ref[...] + b2_ref[...]
          ).astype(jnp.bfloat16)
    dff = w1_ref.shape[1]
    nchunk = -(-dff // dff_chunk)
    y = None
    for c in range(nchunk):                           # chunked dff contraction
        lo = c * dff_chunk
        hi = min(dff, lo + dff_chunk)
        hck = jnp.dot(xn, w1_ref[:, lo:hi],
                      preferred_element_type=jnp.float32) + b1_ref[:, lo:hi]
        hck = jnp.maximum(hck, 0.0).astype(jnp.bfloat16)          # ReLU
        part = jnp.dot(hck, w2_ref[lo:hi, :], preferred_element_type=jnp.float32)
        y = part if y is None else y + part
    y = y + b2f_ref[...]
    o_ref[...] = ((x1 + y) * m_ref[...]).astype(o_ref.dtype)


# ----------------------------------------------------------------------------
# pallas_call wrappers
# ----------------------------------------------------------------------------
def _row_tiled_call(kernel, tiled, consts, out_cols, out_dtype, *,
                    flops=0, transcendentals=0):
    """Run `kernel(*tiled_refs, *const_refs, o_ref)` tiled over rows (dim 0)."""
    M = tiled[0].shape[0]
    tm = M if M <= ROW_TILE else ROW_TILE
    grid = (pl.cdiv(M, tm),)
    in_specs = [pl.BlockSpec((tm, a.shape[1]), lambda i: (i, 0)) for a in tiled]
    in_specs += [_const_spec(c.shape) for c in consts]
    out_spec = pl.BlockSpec((tm, out_cols), lambda i: (i, 0))
    bytes_accessed = int(sum(a.size * a.dtype.itemsize for a in tiled)
                         + sum(c.size * c.dtype.itemsize for c in consts)
                         + M * out_cols * jnp.dtype(out_dtype).itemsize)
    return pl.pallas_call(
        kernel,
        out_shape=jax.ShapeDtypeStruct((M, out_cols), out_dtype),
        grid=grid,
        in_specs=in_specs,
        out_specs=out_spec,
        compiler_params=pltpu.CompilerParams(
            dimension_semantics=("parallel",),
            vmem_limit_bytes=VMEM_LIMIT),
        cost_estimate=pl.CostEstimate(flops=int(flops),
                                      transcendentals=int(transcendentals),
                                      bytes_accessed=bytes_accessed),
    )(*tiled, *consts)


def matmul_bias(x2d, w, b, relu=False, out_dtype=jnp.bfloat16):
    M, K = x2d.shape
    N = w.shape[1]
    return _row_tiled_call(
        functools.partial(_matmul_bias_kernel, relu=relu),
        [x2d], [w, b.reshape(1, N)], N, out_dtype,
        flops=2 * M * K * N)


def embed_call(flat_btf, mask_t, pe, w, b, scale):
    """flat: (B, T, D*F2); mask_t: (B, T, 1); pe: (T, D) resident const -> (B, T, D) bf16."""
    B, T, DF = flat_btf.shape
    D = w.shape[1]
    consts = [pe, w, b.reshape(1, D)]
    return pl.pallas_call(
        functools.partial(_embed_kernel, scale=scale),
        out_shape=jax.ShapeDtypeStruct((B, T, D), jnp.bfloat16),
        grid=(B,),
        in_specs=[pl.BlockSpec((None, T, DF), lambda bb: (bb, 0, 0)),
                  pl.BlockSpec((None, T, 1), lambda bb: (bb, 0, 0))]
                 + [_const_spec(c.shape) for c in consts],
        out_specs=pl.BlockSpec((None, T, D), lambda bb: (bb, 0, 0)),
        compiler_params=pltpu.CompilerParams(
            dimension_semantics=("parallel",),
            vmem_limit_bytes=VMEM_LIMIT),
        cost_estimate=pl.CostEstimate(
            flops=int(2 * B * T * DF * D), transcendentals=0,
            bytes_accessed=int(flat_btf.size * flat_btf.dtype.itemsize
                               + B * T * (D * 2 + 4) + pe.size * 4 + w.size * 2)),
    )(flat_btf, mask_t, *consts)


def ln_qkv(x_btd, p, heads):
    """(B, T, D) bf16 -> head-major Q, K, V, each (B, H, T, dk) bf16 (Q pre-scaled)."""
    B, T, D = x_btd.shape
    dk = D // heads
    consts = [p['ln1_g'].reshape(1, D), p['ln1_b'].reshape(1, D),
              p['wqkv'], p['bqkv'].reshape(1, 3 * D)]
    out_sds = jax.ShapeDtypeStruct((B, heads, T, dk), jnp.bfloat16)
    return pl.pallas_call(
        functools.partial(_ln_qkv_kernel, heads=heads, eps=LN_EPS),
        out_shape=(out_sds, out_sds, out_sds),
        grid=(B,),
        in_specs=[pl.BlockSpec((None, T, D), lambda b: (b, 0, 0))]
                 + [_const_spec(c.shape) for c in consts],
        out_specs=tuple(pl.BlockSpec((None, heads, T, dk), lambda b: (b, 0, 0, 0))
                        for _ in range(3)),
        compiler_params=pltpu.CompilerParams(
            dimension_semantics=("parallel",),
            vmem_limit_bytes=VMEM_LIMIT),
        cost_estimate=pl.CostEstimate(
            flops=int(2 * B * T * D * 3 * D), transcendentals=0,
            bytes_accessed=int(x_btd.size * 2 + 3 * B * heads * T * dk * 2
                               + sum(c.size * c.dtype.itemsize for c in consts))),
    )(x_btd, *consts)


def mha_core(q, k, v, mask_f):
    """q,k,v: (B, H, T, dk) bf16; mask_f: (B, 1, T) {0,1} -> ctx (H, B, T, dk) bf16."""
    B, H, T, dk = q.shape
    tq = T if T <= Q_TILE else Q_TILE
    grid = (B, H, pl.cdiv(T, tq))
    return pl.pallas_call(
        _attn_kernel,
        out_shape=jax.ShapeDtypeStruct((H, B, T, dk), jnp.bfloat16),
        grid=grid,
        in_specs=[pl.BlockSpec((None, None, tq, dk), lambda b, h, i: (b, h, i, 0)),
                  pl.BlockSpec((None, None, T, dk), lambda b, h, i: (b, h, 0, 0)),
                  pl.BlockSpec((None, None, T, dk), lambda b, h, i: (b, h, 0, 0)),
                  pl.BlockSpec((None, 1, T), lambda b, h, i: (b, 0, 0))],
        out_specs=pl.BlockSpec((None, None, tq, dk), lambda b, h, i: (h, b, i, 0)),
        compiler_params=pltpu.CompilerParams(
            dimension_semantics=("parallel", "parallel", "arbitrary"),
            vmem_limit_bytes=VMEM_LIMIT),
        cost_estimate=pl.CostEstimate(
            flops=int(4 * B * H * T * T * dk),
            transcendentals=int(B * H * T * T),
            bytes_accessed=int(4 * q.size * 2 + mask_f.size * 4)),
    )(q, k, v, mask_f)


def fused_out_ffn(ctx_hm, x_rows, mask_rows, p):
    """ctx_hm: (H, M, dk) bf16 head-major context; x_rows: (M, D) bf16 residual (aliased
    with the output); mask_rows: (M, 1) -> (M, D) bf16."""
    H, M, dk = ctx_hm.shape
    D = x_rows.shape[1]
    dff = p['w1'].shape[1]
    tm = M if M <= ROW_TILE else ROW_TILE
    consts = [p['wo'], p['bo'].reshape(1, D),
              p['ln2_g'].reshape(1, D), p['ln2_b'].reshape(1, D),
              p['w1'], p['b1'].reshape(1, dff),
              p['w2'], p['b2'].reshape(1, D)]
    in_specs = [pl.BlockSpec((H, tm, dk), lambda i: (0, i, 0)),
                pl.BlockSpec((tm, D), lambda i: (i, 0)),
                pl.BlockSpec((tm, 1), lambda i: (i, 0))]
    in_specs += [_const_spec(c.shape) for c in consts]
    bytes_accessed = int(ctx_hm.size * 2 + 2 * M * D * 2 + M * 4
                         + sum(c.size * c.dtype.itemsize for c in consts))
    return pl.pallas_call(
        functools.partial(_attn_out_ffn_kernel, eps=LN_EPS, dff_chunk=DFF_CHUNK),
        out_shape=jax.ShapeDtypeStruct((M, D), jnp.bfloat16),
        grid=(pl.cdiv(M, tm),),
        in_specs=in_specs,
        out_specs=pl.BlockSpec((tm, D), lambda i: (i, 0)),
        input_output_aliases={1: 0},          # reuse the residual-stream HBM buffer
        compiler_params=pltpu.CompilerParams(
            dimension_semantics=("parallel",),
            vmem_limit_bytes=VMEM_LIMIT),
        cost_estimate=pl.CostEstimate(
            flops=int(2 * M * (D * D + 2 * D * dff)),
            transcendentals=0,
            bytes_accessed=bytes_accessed),
    )(ctx_hm, x_rows, mask_rows, *consts)


# ----------------------------------------------------------------------------
# Glue (patch extraction / parameter setup) in plain JAX
# ----------------------------------------------------------------------------
def im2col(x, kh, kw, stride):
    """x: (B, C, H, W) -> patches (B, Ho*Wo, C*kh*kw) matching weight.reshape(O, C*kh*kw)."""
    # TODO(synk): fuse the 3x3 window gathers into the conv matmul kernel (strided/Element
    # index maps) to avoid the ~9x patch inflation in HBM for the subsampling front-end.
    B, C, Hd, Wd = x.shape
    Ho = (Hd - kh) // stride + 1
    Wo = (Wd - kw) // stride + 1
    cols = []
    for i in range(kh):
        for j in range(kw):
            cols.append(x[:, :, i:i + stride * Ho:stride, j:j + stride * Wo:stride])
    p = jnp.stack(cols, axis=2)                      # (B, C, kh*kw, Ho, Wo)
    p = p.transpose(0, 3, 4, 1, 2).reshape(B, Ho * Wo, C * kh * kw)
    return p, Ho, Wo


def sinusoidal_pe(max_len, d_model):
    pos = jnp.arange(max_len, dtype=jnp.float32)[:, None]
    div = jnp.exp(jnp.arange(0, d_model, 2, dtype=jnp.float32)
                  * (-math.log(10000.0) / d_model))
    pe = jnp.zeros((max_len, d_model), dtype=jnp.float32)
    pe = pe.at[:, 0::2].set(jnp.sin(pos * div))
    pe = pe.at[:, 1::2].set(jnp.cos(pos * div))
    return pe


def init_params(key, input_size, d_model, heads, linear_units, num_blocks, max_len=512):
    # TODO(synk): on v7x evaluate fp8 weight storage (int8 on v6e) for the projection /
    # FFN matmuls behind an accuracy gate; bf16 kept here as the accuracy-safe default.
    def nrm(k, shape, scale=0.05, dtype=jnp.float32):
        return (scale * jax.random.normal(k, shape, dtype=jnp.float32)).astype(dtype)

    keys = iter(jax.random.split(key, 8 + num_blocks * 16))
    F1 = (input_size - 3) // 2 + 1
    F2 = (F1 - 3) // 2 + 1
    dk = d_model // heads
    qscale = 1.0 / math.sqrt(dk)
    params = {
        'd_model': d_model, 'heads': heads,
        'conv1_w': nrm(next(keys), (1 * 3 * 3, d_model), dtype=jnp.bfloat16),
        'conv1_b': nrm(next(keys), (d_model,)),
        'conv2_w': nrm(next(keys), (d_model * 3 * 3, d_model), dtype=jnp.bfloat16),
        'conv2_b': nrm(next(keys), (d_model,)),
        'embed_w': nrm(next(keys), (d_model * F2, d_model), dtype=jnp.bfloat16),
        'embed_b': nrm(next(keys), (d_model,)),
        'after_norm_g': jnp.ones((d_model,), jnp.float32),
        'after_norm_b': jnp.zeros((d_model,), jnp.float32),
        'pe': sinusoidal_pe(max_len, d_model),
        'blocks': [],
    }
    for _ in range(num_blocks):
        wq = nrm(next(keys), (d_model, d_model)); bq = nrm(next(keys), (d_model,))
        wk = nrm(next(keys), (d_model, d_model)); bk = nrm(next(keys), (d_model,))
        wv = nrm(next(keys), (d_model, d_model)); bv = nrm(next(keys), (d_model,))
        # Fused QKV weight (D, 3D); 1/sqrt(dk) folded into the Q slice (weights + bias).
        wqkv = jnp.concatenate([wq * qscale, wk, wv], axis=1).astype(jnp.bfloat16)
        bqkv = jnp.concatenate([bq * qscale, bk, bv], axis=0)
        wo = nrm(next(keys), (d_model, d_model))
        blk = {
            'ln1_g': jnp.ones((d_model,), jnp.float32),
            'ln1_b': jnp.zeros((d_model,), jnp.float32),
            'ln2_g': jnp.ones((d_model,), jnp.float32),
            'ln2_b': jnp.zeros((d_model,), jnp.float32),
            'wqkv': wqkv, 'bqkv': bqkv,
            # output projection stored head-major (H, dk, D) so the fused kernel can
            # consume the head-major context without any transpose.
            'wo': wo.reshape(heads, dk, d_model).astype(jnp.bfloat16),
            'bo': nrm(next(keys), (d_model,)),
            'w1': nrm(next(keys), (d_model, linear_units), dtype=jnp.bfloat16),
            'b1': nrm(next(keys), (linear_units,)),
            'w2': nrm(next(keys), (linear_units, d_model), dtype=jnp.bfloat16),
            'b2': nrm(next(keys), (d_model,)),
        }
        params['blocks'].append(blk)
    return params


# ----------------------------------------------------------------------------
# Encoder forward
# ----------------------------------------------------------------------------
def encoder_layer(x_rows, mask_f, mask_rows, p, heads, B, T):
    """normalize_before=True, concat_after=False; 3 pallas_calls per layer."""
    D = x_rows.shape[1]
    M = B * T
    # (1) fused LayerNorm1 + QKV projection -> head-major (B, H, T, dk) bf16
    q, k, v = ln_qkv(x_rows.reshape(B, T, D), p, heads)
    # (2) attention core on a (B, H, q-tile) grid, head-major (H, B, T, dk) output
    ctx = mha_core(q, k, v, mask_f)
    ctx_hm = ctx.reshape(heads, M, D // heads)        # contiguous, free reshape
    # (3) fused head-merge/output-proj + residual + LN2 + chunked FFN + residual + mask
    return fused_out_ffn(ctx_hm, x_rows, mask_rows, p)


def transformer_encoder_forward(params, inputs, input_length):
    B, T, F = inputs.shape
    D = params['d_model']
    H = params['heads']

    # get_enc_padding_mask: (B, 1, T) bool, True = valid frame
    mask = (jnp.arange(T)[None, :] < input_length[:, None])[:, None, :]

    # ---- Conv2dSubsampling: two 3x3 stride-2 convs + ReLU as im2col + fused matmuls ----
    x4 = inputs[:, None, :, :]                                   # NCHW (B, 1, T, F)
    p1, T1, F1 = im2col(x4, 3, 3, 2)
    c1 = matmul_bias(p1.reshape(B * T1 * F1, -1), params['conv1_w'], params['conv1_b'],
                     relu=True)
    c1 = c1.reshape(B, T1, F1, D).transpose(0, 3, 1, 2)          # (B, odim, T1, F1)
    p2, T2, F2 = im2col(c1, 3, 3, 2)
    c2 = matmul_bias(p2.reshape(B * T2 * F2, -1), params['conv2_w'], params['conv2_b'],
                     relu=True)
    c2 = c2.reshape(B, T2, F2, D).transpose(0, 3, 1, 2)          # (B, odim, T2, F2)
    flat = c2.transpose(0, 2, 1, 3).reshape(B, T2, D * F2)       # x.transpose(1,2).view(.)

    mask = mask[:, :, :-2:2][:, :, :-2:2]                        # subsampled (B, 1, T2)
    mask_f = mask.astype(jnp.float32)
    mask_t = mask_f.transpose(0, 2, 1)                           # (B, T2, 1)
    mask_rows = mask_t.reshape(B * T2, 1)

    # embed Linear + x*sqrt(D) + resident PE + initial masked_fill, fused (bf16 stream)
    x_btd = embed_call(flat, mask_t, params['pe'][:T2], params['embed_w'],
                       params['embed_b'], math.sqrt(D))
    x_rows = x_btd.reshape(B * T2, D)

    for blk in params['blocks']:
        x_rows = encoder_layer(x_rows, mask_f, mask_rows, blk, H, B, T2)

    # normalize_before=True -> after_norm (f32 output)
    x_out = _row_tiled_call(
        functools.partial(_layernorm_kernel, eps=LN_EPS),
        [x_rows],
        [params['after_norm_g'].reshape(1, D), params['after_norm_b'].reshape(1, D)],
        D, jnp.float32)
    return x_out.reshape(B, T2, D), mask


# ----------------------------------------------------------------------------
if __name__ == "__main__":
    # NOTE: demo shapes (D=32, dk=8) underfill lanes/MXU; real ESPnet configs (D>=256)
    # are the intended perf regime -- do not benchmark at these toy sizes.
    _supports_single_buffered_consts()   # run the Buffered(1) feature probe eagerly

    key = jax.random.PRNGKey(0)
    k_in, k_par = jax.random.split(key)

    # small shapes: batch=2, T=32 frames, F=16 features, d_model=32, 4 heads,
    # linear_units=64, num_blocks=2
    B, T, F = 2, 32, 16
    d_model, heads, linear_units, num_blocks = 32, 4, 64, 2

    inputs = jax.random.normal(k_in, (B, T, F), dtype=jnp.float32)
    input_length = jnp.array([32, 24], dtype=jnp.int32)

    params = init_params(k_par, F, d_model, heads, linear_units, num_blocks)

    fwd = jax.jit(functools.partial(transformer_encoder_forward, params))
    enc_output, enc_mask = fwd(inputs, input_length)
    jax.block_until_ready(enc_output)
    jax.block_until_ready(enc_mask)

    assert enc_output.shape == (B, 7, d_model), enc_output.shape
    assert enc_mask.shape == (B, 1, 7), enc_mask.shape
    assert bool(jnp.all(jnp.isfinite(enc_output)))
    print("KERNEL_OK")
</pallas_src>

<mosaic_0001>
module attributes {stable_mosaic.version = 11 : i64} {
  func.func @_k(%arg0: i32, %arg1: memref<8x128xf32, #tpu.memory_space<vmem>>, %arg2: memref<8x128xf32, #tpu.memory_space<vmem>>, %arg3: memref<8x128xf32, #tpu.memory_space<vmem>>) attributes {dimension_semantics = [#tpu.dimension_semantics<arbitrary>], iteration_bounds = array<i64: 2>, scalar_prefetch = 0 : i64, scratch_operands = 0 : i64, tpu.core_type = #tpu.core_type<tc>, window_params = [{transform_indices = @transform_0, window_bounds = array<i64: 8, 128>}, {pipeline_mode = #tpu.pipeline_mode<synchronous>, transform_indices = @transform_1, window_bounds = array<i64: 8, 128>}, {transform_indices = @transform_2, window_bounds = array<i64: 8, 128>}]} {
    %c0 = arith.constant 0 : index
    %c0_0 = arith.constant 0 : index
    %0 = vector.load %arg1[%c0, %c0_0] : memref<8x128xf32, #tpu.memory_space<vmem>>, vector<8x128xf32>
    %c0_1 = arith.constant 0 : index
    %c0_2 = arith.constant 0 : index
    %1 = vector.load %arg2[%c0_1, %c0_2] : memref<8x128xf32, #tpu.memory_space<vmem>>, vector<8x128xf32>
    %2 = arith.addf %0, %1 : vector<8x128xf32>
    %c0_3 = arith.constant 0 : index
    %c0_4 = arith.constant 0 : index
    %3 = vector.load %arg3[%c0_3, %c0_4] : memref<8x128xf32, #tpu.memory_space<vmem>>, vector<8x128xf32>
    tpu.vector_store %arg3[%c0_3, %c0_4], %2 {strides = array<i32>} : memref<8x128xf32, #tpu.memory_space<vmem>>, vector<8x128xf32>,
    return
  }
  func.func @transform_0(%arg0: i32) -> (i32, i32) {
    %c0_i32 = arith.constant 0 : i32
    %c0_i32_0 = arith.constant 0 : i32
    return %arg0, %c0_i32 : i32, i32
  }
  func.func @transform_1(%arg0: i32) -> (i32, i32) {
    %c0_i32 = arith.constant 0 : i32
    %c0_i32_0 = arith.constant 0 : i32
    %c0_i32_1 = arith.constant 0 : i32
    return %c0_i32, %c0_i32_0 : i32, i32
  }
  func.func @transform_2(%arg0: i32) -> (i32, i32) {
    %c0_i32 = arith.constant 0 : i32
    %c0_i32_0 = arith.constant 0 : i32
    return %arg0, %c0_i32 : i32, i32
  }
}

module attributes {stable_mosaic.version = 11 : i64} {
  func.func @_matmul_bias_kernel(%arg0: i32, %arg1: memref<210x9xf32, #tpu.memory_space<vmem>>, %arg2: memref<9x32xbf16, #tpu.memory_space<vmem>>, %arg3: memref<1x32xf32, #tpu.memory_space<vmem>>, %arg4: memref<210x32xbf16, #tpu.memory_space<vmem>>) attributes {dimension_semantics = [#tpu.dimension_semantics<parallel>], iteration_bounds = array<i64: 1>, scalar_prefetch = 0 : i64, scratch_operands = 0 : i64, tpu.core_type = #tpu.core_type<tc>, window_params = [{transform_indices = @transform_0, window_bounds = array<i64: 210, 9>}, {pipeline_mode = #tpu.pipeline_mode<synchronous>, transform_indices = @transform_1, window_bounds = array<i64: 9, 32>}, {pipeline_mode = #tpu.pipeline_mode<synchronous>, transform_indices = @transform_2, window_bounds = array<i64: 1, 32>}, {transform_indices = @transform_3, window_bounds = array<i64: 210, 32>}]} {
    %c0 = arith.constant 0 : index
    %c0_0 = arith.constant 0 : index
    %0 = vector.load %arg1[%c0, %c0_0] : memref<210x9xf32, #tpu.memory_space<vmem>>, vector<210x9xf32>
    %1 = arith.truncf %0 : vector<210x9xf32> to vector<210x9xbf16>
    %c0_1 = arith.constant 0 : index
    %c0_2 = arith.constant 0 : index
    %2 = vector.load %arg2[%c0_1, %c0_2] : memref<9x32xbf16, #tpu.memory_space<vmem>>, vector<9x32xbf16>
    %cst = arith.constant dense<0.000000e+00> : vector<210x32xf32>
    %3 = tpu.matmul %1, %2, %cst {dimension_numbers = #tpu.dot_dimension_numbers<[1], [0], [0], [1], [0, 0, 1, 1], [], []>} : vector<210x9xbf16>, vector<9x32xbf16>, vector<210x32xf32> -> vector<210x32xf32>
    %c0_3 = arith.constant 0 : index
    %c0_4 = arith.constant 0 : index
    %4 = vector.load %arg3[%c0_3, %c0_4] : memref<1x32xf32, #tpu.memory_space<vmem>>, vector<1x32xf32>
    %5 = vector.broadcast %4 : vector<1x32xf32> to vector<210x32xf32>
    %6 = arith.addf %3, %5 : vector<210x32xf32>
    %cst_5 = arith.constant 0.000000e+00 : f32
    %7 = vector.broadcast %cst_5 : f32 to vector<210x32xf32>
    %8 = arith.maximumf %6, %7 : vector<210x32xf32>
    %9 = arith.truncf %8 : vector<210x32xf32> to vector<210x32xbf16>
    %c0_6 = arith.constant 0 : index
    %c0_7 = arith.constant 0 : index
    %10 = vector.load %arg4[%c0_6, %c0_7] : memref<210x32xbf16, #tpu.memory_space<vmem>>, vector<210x32xbf16>
    tpu.vector_store %arg4[%c0_6, %c0_7], %9 {strides = array<i32>} : memref<210x32xbf16, #tpu.memory_space<vmem>>, vector<210x32xbf16>,
    return
  }
  func.func @transform_0(%arg0: i32) -> (i32, i32) {
    %c0_i32 = arith.constant 0 : i32
    %c0_i32_0 = arith.constant 0 : i32
    return %arg0, %c0_i32 : i32, i32
  }
  func.func @transform_1(%arg0: i32) -> (i32, i32) {
    %c0_i32 = arith.constant 0 : i32
    %c0_i32_0 = arith.constant 0 : i32
    %c0_i32_1 = arith.constant 0 : i32
    return %c0_i32, %c0_i32_0 : i32, i32
  }
  func.func @transform_2(%arg0: i32) -> (i32, i32) {
    %c0_i32 = arith.constant 0 : i32
    %c0_i32_0 = arith.constant 0 : i32
    %c0_i32_1 = arith.constant 0 : i32
    return %c0_i32, %c0_i32_0 : i32, i32
  }
  func.func @transform_3(%arg0: i32) -> (i32, i32) {
    %c0_i32 = arith.constant 0 : i32
    %c0_i32_0 = arith.constant 0 : i32
    return %arg0, %c0_i32 : i32, i32
  }
}

module attributes {stable_mosaic.version = 11 : i64} {
  func.func @_matmul_bias_kernel(%arg0: i32, %arg1: memref<42x288xbf16, #tpu.memory_space<vmem>>, %arg2: memref<288x32xbf16, #tpu.memory_space<vmem>>, %arg3: memref<1x32xf32, #tpu.memory_space<vmem>>, %arg4: memref<42x32xbf16, #tpu.memory_space<vmem>>) attributes {dimension_semantics = [#tpu.dimension_semantics<parallel>], iteration_bounds = array<i64: 1>, scalar_prefetch = 0 : i64, scratch_operands = 0 : i64, tpu.core_type = #tpu.core_type<tc>, window_params = [{transform_indices = @transform_0, window_bounds = array<i64: 42, 288>}, {pipeline_mode = #tpu.pipeline_mode<synchronous>, transform_indices = @transform_1, window_bounds = array<i64: 288, 32>}, {pipeline_mode = #tpu.pipeline_mode<synchronous>, transform_indices = @transform_2, window_bounds = array<i64: 1, 32>}, {transform_indices = @transform_3, window_bounds = array<i64: 42, 32>}]} {
    %c0 = arith.constant 0 : index
    %c0_0 = arith.constant 0 : index
    %0 = vector.load %arg1[%c0, %c0_0] : memref<42x288xbf16, #tpu.memory_space<vmem>>, vector<42x288xbf16>
    %c0_1 = arith.constant 0 : index
    %c0_2 = arith.constant 0 : index
    %1 = vector.load %arg2[%c0_1, %c0_2] : memref<288x32xbf16, #tpu.memory_space<vmem>>, vector<288x32xbf16>
    %cst = arith.constant dense<0.000000e+00> : vector<42x32xf32>
    %2 = tpu.matmul %0, %1, %cst {dimension_numbers = #tpu.dot_dimension_numbers<[1], [0], [0], [1], [0, 0, 1, 1], [], []>} : vector<42x288xbf16>, vector<288x32xbf16>, vector<42x32xf32> -> vector<42x32xf32>
    %c0_3 = arith.constant 0 : index
    %c0_4 = arith.constant 0 : index
    %3 = vector.load %arg3[%c0_3, %c0_4] : memref<1x32xf32, #tpu.memory_space<vmem>>, vector<1x32xf32>
    %4 = vector.broadcast %3 : vector<1x32xf32> to vector<42x32xf32>
    %5 = arith.addf %2, %4 : vector<42x32xf32>
    %cst_5 = arith.constant 0.000000e+00 : f32
    %6 = vector.broadcast %cst_5 : f32 to vector<42x32xf32>
    %7 = arith.maximumf %5, %6 : vector<42x32xf32>
    %8 = arith.truncf %7 : vector<42x32xf32> to vector<42x32xbf16>
    %c0_6 = arith.constant 0 : index
    %c0_7 = arith.constant 0 : index
    %9 = vector.load %arg4[%c0_6, %c0_7] : memref<42x32xbf16, #tpu.memory_space<vmem>>, vector<42x32xbf16>
    tpu.vector_store %arg4[%c0_6, %c0_7], %8 {strides = array<i32>} : memref<42x32xbf16, #tpu.memory_space<vmem>>, vector<42x32xbf16>,
    return
  }
  func.func @transform_0(%arg0: i32) -> (i32, i32) {
    %c0_i32 = arith.constant 0 : i32
    %c0_i32_0 = arith.constant 0 : i32
    return %arg0, %c0_i32 : i32, i32
  }
  func.func @transform_1(%arg0: i32) -> (i32, i32) {
    %c0_i32 = arith.constant 0 : i32
    %c0_i32_0 = arith.constant 0 : i32
    %c0_i32_1 = arith.constant 0 : i32
    return %c0_i32, %c0_i32_0 : i32, i32
  }
  func.func @transform_2(%arg0: i32) -> (i32, i32) {
    %c0_i32 = arith.constant 0 : i32
    %c0_i32_0 = arith.constant 0 : i32
    %c0_i32_1 = arith.constant 0 : i32
    return %c0_i32, %c0_i32_0 : i32, i32
  }
  func.func @transform_3(%arg0: i32) -> (i32, i32) {
    %c0_i32 = arith.constant 0 : i32
    %c0_i32_0 = arith.constant 0 : i32
    return %arg0, %c0_i32 : i32, i32
  }
}

module attributes {stable_mosaic.version = 11 : i64} {
  func.func @_embed_kernel(%arg0: i32, %arg1: memref<1x7x96xbf16, #tpu.memory_space<vmem>>, %arg2: memref<1x7x1xf32, #tpu.memory_space<vmem>>, %arg3: memref<7x32xf32, #tpu.memory_space<vmem>>, %arg4: memref<96x32xbf16, #tpu.memory_space<vmem>>, %arg5: memref<1x32xf32, #tpu.memory_space<vmem>>, %arg6: memref<1x7x32xbf16, #tpu.memory_space<vmem>>) attributes {dimension_semantics = [#tpu.dimension_semantics<parallel>], iteration_bounds = array<i64: 2>, scalar_prefetch = 0 : i64, scratch_operands = 0 : i64, tpu.core_type = #tpu.core_type<tc>, window_params = [{transform_indices = @transform_0, window_bounds = array<i64: 1, 7, 96>}, {transform_indices = @transform_1, window_bounds = array<i64: 1, 7, 1>}, {pipeline_mode = #tpu.pipeline_mode<synchronous>, transform_indices = @transform_2, window_bounds = array<i64: 7, 32>}, {pipeline_mode = #tpu.pipeline_mode<synchronous>, transform_indices = @transform_3, window_bounds = array<i64: 96, 32>}, {pipeline_mode = #tpu.pipeline_mode<synchronous>, transform_indices = @transform_4, window_bounds = array<i64: 1, 32>}, {transform_indices = @transform_5, window_bounds = array<i64: 1, 7, 32>}]} {
    %c0 = arith.constant 0 : index
    %c0_0 = arith.constant 0 : index
    %c0_1 = arith.constant 0 : index
    %0 = vector.load %arg1[%c0, %c0_0, %c0_1] : memref<1x7x96xbf16, #tpu.memory_space<vmem>>, vector<1x7x96xbf16>
    %1 = vector.shape_cast %0 : vector<1x7x96xbf16> to vector<7x96xbf16>
    %c0_2 = arith.constant 0 : index
    %c0_3 = arith.constant 0 : index
    %2 = vector.load %arg4[%c0_2, %c0_3] : memref<96x32xbf16, #tpu.memory_space<vmem>>, vector<96x32xbf16>
    %cst = arith.constant dense<0.000000e+00> : vector<7x32xf32>
    %3 = tpu.matmul %1, %2, %cst {dimension_numbers = #tpu.dot_dimension_numbers<[1], [0], [0], [1], [0, 0, 1, 1], [], []>} : vector<7x96xbf16>, vector<96x32xbf16>, vector<7x32xf32> -> vector<7x32xf32>
    %c0_4 = arith.constant 0 : index
    %c0_5 = arith.constant 0 : index
    %4 = vector.load %arg5[%c0_4, %c0_5] : memref<1x32xf32, #tpu.memory_space<vmem>>, vector<1x32xf32>
    %5 = vector.broadcast %4 : vector<1x32xf32> to vector<7x32xf32>
    %6 = arith.addf %3, %5 : vector<7x32xf32>
    %cst_6 = arith.constant 5.65685415 : f32
    %7 = vector.broadcast %cst_6 : f32 to vector<7x32xf32>
    %8 = arith.mulf %6, %7 : vector<7x32xf32>
    %c0_7 = arith.constant 0 : index
    %c0_8 = arith.constant 0 : index
    %9 = vector.load %arg3[%c0_7, %c0_8] : memref<7x32xf32, #tpu.memory_space<vmem>>, vector<7x32xf32>
    %10 = arith.addf %8, %9 : vector<7x32xf32>
    %c0_9 = arith.constant 0 : index
    %c0_10 = arith.constant 0 : index
    %c0_11 = arith.constant 0 : index
    %11 = vector.load %arg2[%c0_9, %c0_10, %c0_11] : memref<1x7x1xf32, #tpu.memory_space<vmem>>, vector<1x7x1xf32>
    %12 = vector.shape_cast %11 : vector<1x7x1xf32> to vector<7x1xf32>
    %13 = vector.broadcast %12 : vector<7x1xf32> to vector<7x32xf32>
    %14 = arith.mulf %10, %13 : vector<7x32xf32>
    %15 = arith.truncf %14 : vector<7x32xf32> to vector<7x32xbf16>
    %c0_12 = arith.constant 0 : index
    %c0_13 = arith.constant 0 : index
    %c0_14 = arith.constant 0 : index
    %16 = vector.load %arg6[%c0_12, %c0_13, %c0_14] : memref<1x7x32xbf16, #tpu.memory_space<vmem>>, vector<1x7x32xbf16>
    %17 = vector.shape_cast %16 : vector<1x7x32xbf16> to vector<7x32xbf16>
    %18 = vector.shape_cast %15 : vector<7x32xbf16> to vector<1x7x32xbf16>
    tpu.vector_store %arg6[%c0_12, %c0_13, %c0_14], %18 {strides = array<i32>} : memref<1x7x32xbf16, #tpu.memory_space<vmem>>, vector<1x7x32xbf16>,
    return
  }
  func.func @transform_0(%arg0: i32) -> (i32, i32, i32) {
    %c0_i32 = arith.constant 0 : i32
    %c0_i32_0 = arith.constant 0 : i32
    %c0_i32_1 = arith.constant 0 : i32
    return %arg0, %c0_i32, %c0_i32_0 : i32, i32, i32
  }
  func.func @transform_1(%arg0: i32) -> (i32, i32, i32) {
    %c0_i32 = arith.constant 0 : i32
    %c0_i32_0 = arith.constant 0 : i32
    %c0_i32_1 = arith.constant 0 : i32
    return %arg0, %c0_i32, %c0_i32_0 : i32, i32, i32
  }
  func.func @transform_2(%arg0: i32) -> (i32, i32) {
    %c0_i32 = arith.constant 0 : i32
    %c0_i32_0 = arith.constant 0 : i32
    %c0_i32_1 = arith.constant 0 : i32
    return %c0_i32, %c0_i32_0 : i32, i32
  }
  func.func @transform_3(%arg0: i32) -> (i32, i32) {
    %c0_i32 = arith.constant 0 : i32
    %c0_i32_0 = arith.constant 0 : i32
    %c0_i32_1 = arith.constant 0 : i32
    return %c0_i32, %c0_i32_0 : i32, i32
  }
  func.func @transform_4(%arg0: i32) -> (i32, i32) {
    %c0_i32 = arith.constant 0 : i32
    %c0_i32_0 = arith.constant 0 : i32
    %c0_i32_1 = arith.constant 0 : i32
    return %c0_i32, %c0_i32_0 : i32, i32
  }
  func.func @transform_5(%arg0: i32) -> (i32, i32, i32) {
    %c0_i32 = arith.constant 0 : i32
    %c0_i32_0 = arith.constant 0 : i32
    %c0_i32_1 = arith.constant 0 : i32
    return %arg0, %c0_i32, %c0_i32_0 : i32, i32, i32
  }
}

module attributes {stable_mosaic.version = 11 : i64} {
  func.func @_ln_qkv_kernel(%arg0: i32, %arg1: memref<1x7x32xbf16, #tpu.memory_space<vmem>>, %arg2: memref<1x32xf32, #tpu.memory_space<vmem>>, %arg3: memref<1x32xf32, #tpu.memory_space<vmem>>, %arg4: memref<32x96xbf16, #tpu.memory_space<vmem>>, %arg5: memref<1x96xf32, #tpu.memory_space<vmem>>, %arg6: memref<1x4x7x8xbf16, #tpu.memory_space<vmem>>, %arg7: memref<1x4x7x8xbf16, #tpu.memory_space<vmem>>, %arg8: memref<1x4x7x8xbf16, #tpu.memory_space<vmem>>) attributes {dimension_semantics = [#tpu.dimension_semantics<parallel>], iteration_bounds = array<i64: 2>, scalar_prefetch = 0 : i64, scratch_operands = 0 : i64, tpu.core_type = #tpu.core_type<tc>, window_params = [{transform_indices = @transform_0, window_bounds = array<i64: 1, 7, 32>}, {pipeline_mode = #tpu.pipeline_mode<synchronous>, transform_indices = @transform_1, window_bounds = array<i64: 1, 32>}, {pipeline_mode = #tpu.pipeline_mode<synchronous>, transform_indices = @transform_2, window_bounds = array<i64: 1, 32>}, {pipeline_mode = #tpu.pipeline_mode<synchronous>, transform_indices = @transform_3, window_bounds = array<i64: 32, 96>}, {pipeline_mode = #tpu.pipeline_mode<synchronous>, transform_indices = @transform_4, window_bounds = array<i64: 1, 96>}, {transform_indices = @transform_5, window_bounds = array<i64: 1, 4, 7, 8>}, {transform_indices = @transform_6, window_bounds = array<i64: 1, 4, 7, 8>}, {transform_indices = @transform_7, window_bounds = array<i64: 1, 4, 7, 8>}]} {
    %c0 = arith.constant 0 : index
    %c0_0 = arith.constant 0 : index
    %c0_1 = arith.constant 0 : index
    %0 = vector.load %arg1[%c0, %c0_0, %c0_1] : memref<1x7x32xbf16, #tpu.memory_space<vmem>>, vector<1x7x32xbf16>
    %1 = vector.shape_cast %0 : vector<1x7x32xbf16> to vector<7x32xbf16>
    %2 = arith.extf %1 : vector<7x32xbf16> to vector<7x32xf32>
    %cst = arith.constant dense<0.000000e+00> : vector<7xf32>
    %3 = vector.multi_reduction <add>, %2, %cst [1] : vector<7x32xf32> to vector<7xf32>
    %4 = vector.shape_cast %3 : vector<7xf32> to vector<7x1xf32>
    %cst_2 = arith.constant 3.200000e+01 : f32
    %5 = vector.broadcast %cst_2 : f32 to vector<7x1xf32>
    %6 = arith.divf %4, %5 : vector<7x1xf32>
    %7 = vector.broadcast %6 : vector<7x1xf32> to vector<7x32xf32>
    %8 = arith.subf %2, %7 : vector<7x32xf32>
    %9 = arith.mulf %8, %8 : vector<7x32xf32>
    %cst_3 = arith.constant dense<0.000000e+00> : vector<7xf32>
    %10 = vector.multi_reduction <add>, %9, %cst_3 [1] : vector<7x32xf32> to vector<7xf32>
    %11 = vector.shape_cast %10 : vector<7xf32> to vector<7x1xf32>
    %cst_4 = arith.constant 3.200000e+01 : f32
    %12 = vector.broadcast %cst_4 : f32 to vector<7x1xf32>
    %13 = arith.divf %11, %12 : vector<7x1xf32>
    %14 = vector.broadcast %6 : vector<7x1xf32> to vector<7x32xf32>
    %15 = arith.subf %2, %14 : vector<7x32xf32>
    %cst_5 = arith.constant 9.99999996E-13 : f32
    %16 = vector.broadcast %cst_5 : f32 to vector<7x1xf32>
    %17 = arith.addf %13, %16 : vector<7x1xf32>
    %18 = math.rsqrt %17 : vector<7x1xf32>
    %19 = vector.broadcast %18 : vector<7x1xf32> to vector<7x32xf32>
    %20 = arith.mulf %15, %19 : vector<7x32xf32>
    %c0_6 = arith.constant 0 : index
    %c0_7 = arith.constant 0 : index
    %21 = vector.load %arg2[%c0_6, %c0_7] : memref<1x32xf32, #tpu.memory_space<vmem>>, vector<1x32xf32>
    %22 = vector.broadcast %21 : vector<1x32xf32> to vector<7x32xf32>
    %23 = arith.mulf %20, %22 : vector<7x32xf32>
    %c0_8 = arith.constant 0 : index
    %c0_9 = arith.constant 0 : index
    %24 = vector.load %arg3[%c0_8, %c0_9] : memref<1x32xf32, #tpu.memory_space<vmem>>, vector<1x32xf32>
    %25 = vector.broadcast %24 : vector<1x32xf32> to vector<7x32xf32>
    %26 = arith.addf %23, %25 : vector<7x32xf32>
    %27 = arith.truncf %26 : vector<7x32xf32> to vector<7x32xbf16>
    %c0_10 = arith.constant 0 : index
    %c0_11 = arith.constant 0 : index
    %28 = vector.load %arg4[%c0_10, %c0_11] : memref<32x96xbf16, #tpu.memory_space<vmem>>, vector<32x96xbf16>
    %cst_12 = arith.constant dense<0.000000e+00> : vector<7x96xf32>
    %29 = tpu.matmul %27, %28, %cst_12 {dimension_numbers = #tpu.dot_dimension_numbers<[1], [0], [0], [1], [0, 0, 1, 1], [], []>} : vector<7x32xbf16>, vector<32x96xbf16>, vector<7x96xf32> -> vector<7x96xf32>
    %c0_13 = arith.constant 0 : index
    %c0_14 = arith.constant 0 : index
    %30 = vector.load %arg5[%c0_13, %c0_14] : memref<1x96xf32, #tpu.memory_space<vmem>>, vector<1x96xf32>
    %31 = vector.broadcast %30 : vector<1x96xf32> to vector<7x96xf32>
    %32 = arith.addf %29, %31 : vector<7x96xf32>
    %33 = arith.truncf %32 : vector<7x96xf32> to vector<7x96xbf16>
    %34 = vector.extract_strided_slice %33 {offsets = [0, 0], sizes = [7, 8], strides = [1, 1]} : vector<7x96xbf16> to vector<7x8xbf16>
    %c0_15 = arith.constant 0 : index
    %c0_16 = arith.constant 0 : index
    %c0_17 = arith.constant 0 : index
    %c0_18 = arith.constant 0 : index
    %35 = vector.load %arg6[%c0_15, %c0_16, %c0_17, %c0_18] : memref<1x4x7x8xbf16, #tpu.memory_space<vmem>>, vector<1x1x7x8xbf16>
    %36 = vector.shape_cast %35 : vector<1x1x7x8xbf16> to vector<7x8xbf16>
    %37 = vector.shape_cast %34 : vector<7x8xbf16> to vector<1x1x7x8xbf16>
    tpu.vector_store %arg6[%c0_15, %c0_16, %c0_17, %c0_18], %37 {strides = array<i32>} : memref<1x4x7x8xbf16, #tpu.memory_space<vmem>>, vector<1x1x7x8xbf16>,
    %38 = vector.extract_strided_slice %33 {offsets = [0, 32], sizes = [7, 8], strides = [1, 1]} : vector<7x96xbf16> to vector<7x8xbf16>
    %c0_19 = arith.constant 0 : index
    %c0_20 = arith.constant 0 : index
    %c0_21 = arith.constant 0 : index
    %c0_22 = arith.constant 0 : index
    %39 = vector.load %arg7[%c0_19, %c0_20, %c0_21, %c0_22] : memref<1x4x7x8xbf16, #tpu.memory_space<vmem>>, vector<1x1x7x8xbf16>
    %40 = vector.shape_cast %39 : vector<1x1x7x8xbf16> to vector<7x8xbf16>
    %41 = vector.shape_cast %38 : vector<7x8xbf16> to vector<1x1x7x8xbf16>
    tpu.vector_store %arg7[%c0_19, %c0_20, %c0_21, %c0_22], %41 {strides = array<i32>} : memref<1x4x7x8xbf16, #tpu.memory_space<vmem>>, vector<1x1x7x8xbf16>,
    %42 = vector.extract_strided_slice %33 {offsets = [0, 64], sizes = [7, 8], strides = [1, 1]} : vector<7x96xbf16> to vector<7x8xbf16>
    %c0_23 = arith.constant 0 : index
    %c0_24 = arith.constant 0 : index
    %c0_25 = arith.constant 0 : index
    %c0_26 = arith.constant 0 : index
    %43 = vector.load %arg8[%c0_23, %c0_24, %c0_25, %c0_26] : memref<1x4x7x8xbf16, #tpu.memory_space<vmem>>, vector<1x1x7x8xbf16>
    %44 = vector.shape_cast %43 : vector<1x1x7x8xbf16> to vector<7x8xbf16>
    %45 = vector.shape_cast %42 : vector<7x8xbf16> to vector<1x1x7x8xbf16>
    tpu.vector_store %arg8[%c0_23, %c0_24, %c0_25, %c0_26], %45 {strides = array<i32>} : memref<1x4x7x8xbf16, #tpu.memory_space<vmem>>, vector<1x1x7x8xbf16>,
    %46 = vector.extract_strided_slice %33 {offsets = [0, 8], sizes = [7, 8], strides = [1, 1]} : vector<7x96xbf16> to vector<7x8xbf16>
    %c0_27 = arith.constant 0 : index
    %c1 = arith.constant 1 : index
    %c0_28 = arith.constant 0 : index
    %c0_29 = arith.constant 0 : index
    %47 = vector.load %arg6[%c0_27, %c1, %c0_28, %c0_29] : memref<1x4x7x8xbf16, #tpu.memory_space<vmem>>, vector<1x1x7x8xbf16>
    %48 = vector.shape_cast %47 : vector<1x1x7x8xbf16> to vector<7x8xbf16>
    %49 = vector.shape_cast %46 : vector<7x8xbf16> to vector<1x1x7x8xbf16>
    tpu.vector_store %arg6[%c0_27, %c1, %c0_28, %c0_29], %49 {strides = array<i32>} : memref<1x4x7x8xbf16, #tpu.memory_space<vmem>>, vector<1x1x7x8xbf16>,
    %50 = vector.extract_strided_slice %33 {offsets = [0, 40], sizes = [7, 8], strides = [1, 1]} : vector<7x96xbf16> to vector<7x8xbf16>
    %c0_30 = arith.constant 0 : index
    %c1_31 = arith.constant 1 : index
    %c0_32 = arith.constant 0 : index
    %c0_33 = arith.constant 0 : index
    %51 = vector.load %arg7[%c0_30, %c1_31, %c0_32, %c0_33] : memref<1x4x7x8xbf16, #tpu.memory_space<vmem>>, vector<1x1x7x8xbf16>
    %52 = vector.shape_cast %51 : vector<1x1x7x8xbf16> to vector<7x8xbf16>
    %53 = vector.shape_cast %50 : vector<7x8xbf16> to vector<1x1x7x8xbf16>
    tpu.vector_store %arg7[%c0_30, %c1_31, %c0_32, %c0_33], %53 {strides = array<i32>} : memref<1x4x7x8xbf16, #tpu.memory_space<vmem>>, vector<1x1x7x8xbf16>,
    %54 = vector.extract_strided_slice %33 {offsets = [0, 72], sizes = [7, 8], strides = [1, 1]} : vector<7x96xbf16> to vector<7x8xbf16>
    %c0_34 = arith.constant 0 : index
    %c1_35 = arith.constant 1 : index
    %c0_36 = arith.constant 0 : index
    %c0_37 = arith.constant 0 : index
    %55 = vector.load %arg8[%c0_34, %c1_35, %c0_36, %c0_37] : memref<1x4x7x8xbf16, #tpu.memory_space<vmem>>, vector<1x1x7x8xbf16>
    %56 = vector.shape_cast %55 : vector<1x1x7x8xbf16> to vector<7x8xbf16>
    %57 = vector.shape_cast %54 : vector<7x8xbf16> to vector<1x1x7x8xbf16>
    tpu.vector_store %arg8[%c0_34, %c1_35, %c0_36, %c0_37], %57 {strides = array<i32>} : memref<1x4x7x8xbf16, #tpu.memory_space<vmem>>, vector<1x1x7x8xbf16>,
    %58 = vector.extract_strided_slice %33 {offsets = [0, 16], sizes = [7, 8], strides = [1, 1]} : vector<7x96xbf16> to vector<7x8xbf16>
    %c0_38 = arith.constant 0 : index
    %c2 = arith.constant 2 : index
    %c0_39 = arith.constant 0 : index
    %c0_40 = arith.constant 0 : index
    %59 = vector.load %arg6[%c0_38, %c2, %c0_39, %c0_40] : memref<1x4x7x8xbf16, #tpu.memory_space<vmem>>, vector<1x1x7x8xbf16>
    %60 = vector.shape_cast %59 : vector<1x1x7x8xbf16> to vector<7x8xbf16>
    %61 = vector.shape_cast %58 : vector<7x8xbf16> to vector<1x1x7x8xbf16>
    tpu.vector_store %arg6[%c0_38, %c2, %c0_39, %c0_40], %61 {strides = array<i32>} : memref<1x4x7x8xbf16, #tpu.memory_space<vmem>>, vector<1x1x7x8xbf16>,
    %62 = vector.extract_strided_slice %33 {offsets = [0, 48], sizes = [7, 8], strides = [1, 1]} : vector<7x96xbf16> to vector<7x8xbf16>
    %c0_41 = arith.constant 0 : index
    %c2_42 = arith.constant 2 : index
    %c0_43 = arith.constant 0 : index
    %c0_44 = arith.constant 0 : index
    %63 = vector.load %arg7[%c0_41, %c2_42, %c0_43, %c0_44] : memref<1x4x7x8xbf16, #tpu.memory_space<vmem>>, vector<1x1x7x8xbf16>
    %64 = vector.shape_cast %63 : vector<1x1x7x8xbf16> to vector<7x8xbf16>
    %65 = vector.shape_cast %62 : vector<7x8xbf16> to vector<1x1x7x8xbf16>
    tpu.vector_store %arg7[%c0_41, %c2_42, %c0_43, %c0_44], %65 {strides = array<i32>} : memref<1x4x7x8xbf16, #tpu.memory_space<vmem>>, vector<1x1x7x8xbf16>,
    %66 = vector.extract_strided_slice %33 {offsets = [0, 80], sizes = [7, 8], strides = [1, 1]} : vector<7x96xbf16> to vector<7x8xbf16>
    %c0_45 = arith.constant 0 : index
    %c2_46 = arith.constant 2 : index
    %c0_47 = arith.constant 0 : index
    %c0_48 = arith.constant 0 : index
    %67 = vector.load %arg8[%c0_45, %c2_46, %c0_47, %c0_48] : memref<1x4x7x8xbf16, #tpu.memory_space<vmem>>, vector<1x1x7x8xbf16>
    %68 = vector.shape_cast %67 : vector<1x1x7x8xbf16> to vector<7x8xbf16>
    %69 = vector.shape_cast %66 : vector<7x8xbf16> to vector<1x1x7x8xbf16>
    tpu.vector_store %arg8[%c0_45, %c2_46, %c0_47, %c0_48], %69 {strides = array<i32>} : memref<1x4x7x8xbf16, #tpu.memory_space<vmem>>, vector<1x1x7x8xbf16>,
    %70 = vector.extract_strided_slice %33 {offsets = [0, 24], sizes = [7, 8], strides = [1, 1]} : vector<7x96xbf16> to vector<7x8xbf16>
    %c0_49 = arith.constant 0 : index
    %c3 = arith.constant 3 : index
    %c0_50 = arith.constant 0 : index
    %c0_51 = arith.constant 0 : index
    %71 = vector.load %arg6[%c0_49, %c3, %c0_50, %c0_51] : memref<1x4x7x8xbf16, #tpu.memory_space<vmem>>, vector<1x1x7x8xbf16>
    %72 = vector.shape_cast %71 : vector<1x1x7x8xbf16> to vector<7x8xbf16>
    %73 = vector.shape_cast %70 : vector<7x8xbf16> to vector<1x1x7x8xbf16>
    tpu.vector_store %arg6[%c0_49, %c3, %c0_50, %c0_51], %73 {strides = array<i32>} : memref<1x4x7x8xbf16, #tpu.memory_space<vmem>>, vector<1x1x7x8xbf16>,
    %74 = vector.extract_strided_slice %33 {offsets = [0, 56], sizes = [7, 8], strides = [1, 1]} : vector<7x96xbf16> to vector<7x8xbf16>
    %c0_52 = arith.constant 0 : index
    %c3_53 = arith.constant 3 : index
    %c0_54 = arith.constant 0 : index
    %c0_55 = arith.constant 0 : index
    %75 = vector.load %arg7[%c0_52, %c3_53, %c0_54, %c0_55] : memref<1x4x7x8xbf16, #tpu.memory_space<vmem>>, vector<1x1x7x8xbf16>
    %76 = vector.shape_cast %75 : vector<1x1x7x8xbf16> to vector<7x8xbf16>
    %77 = vector.shape_cast %74 : vector<7x8xbf16> to vector<1x1x7x8xbf16>
    tpu.vector_store %arg7[%c0_52, %c3_53, %c0_54, %c0_55], %77 {strides = array<i32>} : memref<1x4x7x8xbf16, #tpu.memory_space<vmem>>, vector<1x1x7x8xbf16>,
    %78 = vector.extract_strided_slice %33 {offsets = [0, 88], sizes = [7, 8], strides = [1, 1]} : vector<7x96xbf16> to vector<7x8xbf16>
    %c0_56 = arith.constant 0 : index
    %c3_57 = arith.constant 3 : index
    %c0_58 = arith.constant 0 : index
    %c0_59 = arith.constant 0 : index
    %79 = vector.load %arg8[%c0_56, %c3_57, %c0_58, %c0_59] : memref<1x4x7x8xbf16, #tpu.memory_space<vmem>>, vector<1x1x7x8xbf16>
    %80 = vector.shape_cast %79 : vector<1x1x7x8xbf16> to vector<7x8xbf16>
    %81 = vector.shape_cast %78 : vector<7x8xbf16> to vector<1x1x7x8xbf16>
    tpu.vector_store %arg8[%c0_56, %c3_57, %c0_58, %c0_59], %81 {strides = array<i32>} : memref<1x4x7x8xbf16, #tpu.memory_space<vmem>>, vector<1x1x7x8xbf16>,
    return
  }
  func.func @transform_0(%arg0: i32) -> (i32, i32, i32) {
    %c0_i32 = arith.constant 0 : i32
    %c0_i32_0 = arith.constant 0 : i32
    %c0_i32_1 = arith.constant 0 : i32
    return %arg0, %c0_i32, %c0_i32_0 : i32, i32, i32
  }
  func.func @transform_1(%arg0: i32) -> (i32, i32) {
    %c0_i32 = arith.constant 0 : i32
    %c0_i32_0 = arith.constant 0 : i32
    %c0_i32_1 = arith.constant 0 : i32
    return %c0_i32, %c0_i32_0 : i32, i32
  }
  func.func @transform_2(%arg0: i32) -> (i32, i32) {
    %c0_i32 = arith.constant 0 : i32
    %c0_i32_0 = arith.constant 0 : i32
    %c0_i32_1 = arith.constant 0 : i32
    return %c0_i32, %c0_i32_0 : i32, i32
  }
  func.func @transform_3(%arg0: i32) -> (i32, i32) {
    %c0_i32 = arith.constant 0 : i32
    %c0_i32_0 = arith.constant 0 : i32
    %c0_i32_1 = arith.constant 0 : i32
    return %c0_i32, %c0_i32_0 : i32, i32
  }
  func.func @transform_4(%arg0: i32) -> (i32, i32) {
    %c0_i32 = arith.constant 0 : i32
    %c0_i32_0 = arith.constant 0 : i32
    %c0_i32_1 = arith.constant 0 : i32
    return %c0_i32, %c0_i32_0 : i32, i32
  }
  func.func @transform_5(%arg0: i32) -> (i32, i32, i32, i32) {
    %c0_i32 = arith.constant 0 : i32
    %c0_i32_0 = arith.constant 0 : i32
    %c0_i32_1 = arith.constant 0 : i32
    %c0_i32_2 = arith.constant 0 : i32
    return %arg0, %c0_i32, %c0_i32_0, %c0_i32_1 : i32, i32, i32, i32
  }
  func.func @transform_6(%arg0: i32) -> (i32, i32, i32, i32) {
    %c0_i32 = arith.constant 0 : i32
    %c0_i32_0 = arith.constant 0 : i32
    %c0_i32_1 = arith.constant 0 : i32
    %c0_i32_2 = arith.constant 0 : i32
    return %arg0, %c0_i32, %c0_i32_0, %c0_i32_1 : i32, i32, i32, i32
  }
  func.func @transform_7(%arg0: i32) -> (i32, i32, i32, i32) {
    %c0_i32 = arith.constant 0 : i32
    %c0_i32_0 = arith.constant 0 : i32
    %c0_i32_1 = arith.constant 0 : i32
    %c0_i32_2 = arith.constant 0 : i32
    return %arg0, %c0_i32, %c0_i32_0, %c0_i32_1 : i32, i32, i32, i32
  }
}

module attributes {stable_mosaic.version = 11 : i64} {
  func.func @_attn_kernel(%arg0: i32, %arg1: i32, %arg2: i32, %arg3: memref<1x1x7x8xbf16, #tpu.memory_space<vmem>>, %arg4: memref<1x1x7x8xbf16, #tpu.memory_space<vmem>>, %arg5: memref<1x1x7x8xbf16, #tpu.memory_space<vmem>>, %arg6: memref<1x1x7xf32, #tpu.memory_space<vmem>>, %arg7: memref<1x1x7x8xbf16, #tpu.memory_space<vmem>>) attributes {dimension_semantics = [#tpu.dimension_semantics<parallel>, #tpu.dimension_semantics<parallel>, #tpu.dimension_semantics<arbitrary>], iteration_bounds = array<i64: 2, 4, 1>, scalar_prefetch = 0 : i64, scratch_operands = 0 : i64, tpu.core_type = #tpu.core_type<tc>, window_params = [{transform_indices = @transform_0, window_bounds = array<i64: 1, 1, 7, 8>}, {transform_indices = @transform_1, window_bounds = array<i64: 1, 1, 7, 8>}, {transform_indices = @transform_2, window_bounds = array<i64: 1, 1, 7, 8>}, {transform_indices = @transform_3, window_bounds = array<i64: 1, 1, 7>}, {transform_indices = @transform_4, window_bounds = array<i64: 1, 1, 7, 8>}]} {
    %c0 = arith.constant 0 : index
    %c0_0 = arith.constant 0 : index
    %c0_1 = arith.constant 0 : index
    %c0_2 = arith.constant 0 : index
    %0 = vector.load %arg3[%c0, %c0_0, %c0_1, %c0_2] : memref<1x1x7x8xbf16, #tpu.memory_space<vmem>>, vector<1x1x7x8xbf16>
    %1 = vector.shape_cast %0 : vector<1x1x7x8xbf16> to vector<7x8xbf16>
    %c0_3 = arith.constant 0 : index
    %c0_4 = arith.constant 0 : index
    %c0_5 = arith.constant 0 : index
    %c0_6 = arith.constant 0 : index
    %2 = vector.load %arg4[%c0_3, %c0_4, %c0_5, %c0_6] : memref<1x1x7x8xbf16, #tpu.memory_space<vmem>>, vector<1x1x7x8xbf16>
    %3 = vector.shape_cast %2 : vector<1x1x7x8xbf16> to vector<7x8xbf16>
    %cst = arith.constant dense<0.000000e+00> : vector<7x7xf32>
    %4 = tpu.matmul %1, %3, %cst {dimension_numbers = #tpu.dot_dimension_numbers<[1], [1], [0], [0], [0, 0, 1, 0], [], []>} : vector<7x8xbf16>, vector<7x8xbf16>, vector<7x7xf32> -> vector<7x7xf32>
    %c0_7 = arith.constant 0 : index
    %c0_8 = arith.constant 0 : index
    %c0_9 = arith.constant 0 : index
    %5 = vector.load %arg6[%c0_7, %c0_8, %c0_9] : memref<1x1x7xf32, #tpu.memory_space<vmem>>, vector<1x1x7xf32>
    %6 = vector.shape_cast %5 : vector<1x1x7xf32> to vector<1x7xf32>
    %cst_10 = arith.constant 5.000000e-01 : f32
    %7 = vector.broadcast %cst_10 : f32 to vector<1x7xf32>
    %8 = arith.cmpf ogt, %6, %7 : vector<1x7xf32>
    %cst_11 = arith.constant -3.40282347E+38 : f32
    %9 = vector.shape_cast %8 : vector<1x7xi1> to vector<1x7xi1>
    %10 = vector.broadcast %9 : vector<1x7xi1> to vector<7x7xi1>
    %11 = vector.broadcast %cst_11 : f32 to vector<7x7xf32>
    %12 = arith.select %10, %4, %11 : vector<7x7xi1>, vector<7x7xf32>
    %cst_12 = arith.constant dense<0xFF800000> : vector<7xf32>
    %13 = vector.multi_reduction <maximumf>, %12, %cst_12 [1] : vector<7x7xf32> to vector<7xf32>
    %14 = vector.shape_cast %13 : vector<7xf32> to vector<7x1xf32>
    %15 = vector.broadcast %14 : vector<7x1xf32> to vector<7x7xf32>
    %16 = arith.subf %12, %15 : vector<7x7xf32>
    %17 = math.exp %16 : vector<7x7xf32>
    %cst_13 = arith.constant dense<0.000000e+00> : vector<7xf32>
    %18 = vector.multi_reduction <add>, %17, %cst_13 [1] : vector<7x7xf32> to vector<7xf32>
    %19 = vector.shape_cast %18 : vector<7xf32> to vector<7x1xf32>
    %20 = tpu.reciprocal %19 {approx = true} : vector<7x1xf32> -> vector<7x1xf32>
    %21 = vector.broadcast %20 : vector<7x1xf32> to vector<7x7xf32>
    %22 = arith.mulf %17, %21 : vector<7x7xf32>
    %23 = arith.truncf %22 : vector<7x7xf32> to vector<7x7xbf16>
    %c0_14 = arith.constant 0 : index
    %c0_15 = arith.constant 0 : index
    %c0_16 = arith.constant 0 : index
    %c0_17 = arith.constant 0 : index
    %24 = vector.load %arg5[%c0_14, %c0_15, %c0_16, %c0_17] : memref<1x1x7x8xbf16, #tpu.memory_space<vmem>>, vector<1x1x7x8xbf16>
    %25 = vector.shape_cast %24 : vector<1x1x7x8xbf16> to vector<7x8xbf16>
    %cst_18 = arith.constant dense<0.000000e+00> : vector<7x8xf32>
    %26 = tpu.matmul %23, %25, %cst_18 {dimension_numbers = #tpu.dot_dimension_numbers<[1], [0], [0], [1], [0, 0, 1, 1], [], []>} : vector<7x7xbf16>, vector<7x8xbf16>, vector<7x8xf32> -> vector<7x8xf32>
    %27 = arith.truncf %26 : vector<7x8xf32> to vector<7x8xbf16>
    %c0_19 = arith.constant 0 : index
    %c0_20 = arith.constant 0 : index
    %c0_21 = arith.constant 0 : index
    %c0_22 = arith.constant 0 : index
    %28 = vector.load %arg7[%c0_19, %c0_20, %c0_21, %c0_22] : memref<1x1x7x8xbf16, #tpu.memory_space<vmem>>, vector<1x1x7x8xbf16>
    %29 = vector.shape_cast %28 : vector<1x1x7x8xbf16> to vector<7x8xbf16>
    %30 = vector.shape_cast %27 : vector<7x8xbf16> to vector<1x1x7x8xbf16>
    tpu.vector_store %arg7[%c0_19, %c0_20, %c0_21, %c0_22], %30 {strides = array<i32>} : memref<1x1x7x8xbf16, #tpu.memory_space<vmem>>, vector<1x1x7x8xbf16>,
    return
  }
  func.func @transform_0(%arg0: i32, %arg1: i32, %arg2: i32) -> (i32, i32, i32, i32) {
    %c0_i32 = arith.constant 0 : i32
    %c0_i32_0 = arith.constant 0 : i32
    return %arg0, %arg1, %arg2, %c0_i32 : i32, i32, i32, i32
  }
  func.func @transform_1(%arg0: i32, %arg1: i32, %arg2: i32) -> (i32, i32, i32, i32) {
    %c0_i32 = arith.constant 0 : i32
    %c0_i32_0 = arith.constant 0 : i32
    %c0_i32_1 = arith.constant 0 : i32
    return %arg0, %arg1, %c0_i32, %c0_i32_0 : i32, i32, i32, i32
  }
  func.func @transform_2(%arg0: i32, %arg1: i32, %arg2: i32) -> (i32, i32, i32, i32) {
    %c0_i32 = arith.constant 0 : i32
    %c0_i32_0 = arith.constant 0 : i32
    %c0_i32_1 = arith.constant 0 : i32
    return %arg0, %arg1, %c0_i32, %c0_i32_0 : i32, i32, i32, i32
  }
  func.func @transform_3(%arg0: i32, %arg1: i32, %arg2: i32) -> (i32, i32, i32) {
    %c0_i32 = arith.constant 0 : i32
    %c0_i32_0 = arith.constant 0 : i32
    %c0_i32_1 = arith.constant 0 : i32
    return %arg0, %c0_i32, %c0_i32_0 : i32, i32, i32
  }
  func.func @transform_4(%arg0: i32, %arg1: i32, %arg2: i32) -> (i32, i32, i32, i32) {
    %c0_i32 = arith.constant 0 : i32
    %c0_i32_0 = arith.constant 0 : i32
    return %arg1, %arg0, %arg2, %c0_i32 : i32, i32, i32, i32
  }
}

module attributes {stable_mosaic.version = 11 : i64} {
  func.func @_layernorm_kernel(%arg0: i32, %arg1: memref<14x32xbf16, #tpu.memory_space<vmem>>, %arg2: memref<1x32xf32, #tpu.memory_space<vmem>>, %arg3: memref<1x32xf32, #tpu.memory_space<vmem>>, %arg4: memref<14x32xf32, #tpu.memory_space<vmem>>) attributes {dimension_semantics = [#tpu.dimension_semantics<parallel>], iteration_bounds = array<i64: 1>, scalar_prefetch = 0 : i64, scratch_operands = 0 : i64, tpu.core_type = #tpu.core_type<tc>, window_params = [{transform_indices = @transform_0, window_bounds = array<i64: 14, 32>}, {pipeline_mode = #tpu.pipeline_mode<synchronous>, transform_indices = @transform_1, window_bounds = array<i64: 1, 32>}, {pipeline_mode = #tpu.pipeline_mode<synchronous>, transform_indices = @transform_2, window_bounds = array<i64: 1, 32>}, {transform_indices = @transform_3, window_bounds = array<i64: 14, 32>}]} {
    %c0 = arith.constant 0 : index
    %c0_0 = arith.constant 0 : index
    %0 = vector.load %arg1[%c0, %c0_0] : memref<14x32xbf16, #tpu.memory_space<vmem>>, vector<14x32xbf16>
    %1 = arith.extf %0 : vector<14x32xbf16> to vector<14x32xf32>
    %cst = arith.constant dense<0.000000e+00> : vector<14xf32>
    %2 = vector.multi_reduction <add>, %1, %cst [1] : vector<14x32xf32> to vector<14xf32>
    %3 = vector.shape_cast %2 : vector<14xf32> to vector<14x1xf32>
    %cst_1 = arith.constant 3.200000e+01 : f32
    %4 = vector.broadcast %cst_1 : f32 to vector<14x1xf32>
    %5 = arith.divf %3, %4 : vector<14x1xf32>
    %6 = vector.broadcast %5 : vector<14x1xf32> to vector<14x32xf32>
    %7 = arith.subf %1, %6 : vector<14x32xf32>
    %8 = arith.mulf %7, %7 : vector<14x32xf32>
    %cst_2 = arith.constant dense<0.000000e+00> : vector<14xf32>
    %9 = vector.multi_reduction <add>, %8, %cst_2 [1] : vector<14x32xf32> to vector<14xf32>
    %10 = vector.shape_cast %9 : vector<14xf32> to vector<14x1xf32>
    %cst_3 = arith.constant 3.200000e+01 : f32
    %11 = vector.broadcast %cst_3 : f32 to vector<14x1xf32>
    %12 = arith.divf %10, %11 : vector<14x1xf32>
    %13 = vector.broadcast %5 : vector<14x1xf32> to vector<14x32xf32>
    %14 = arith.subf %1, %13 : vector<14x32xf32>
    %cst_4 = arith.constant 9.99999996E-13 : f32
    %15 = vector.broadcast %cst_4 : f32 to vector<14x1xf32>
    %16 = arith.addf %12, %15 : vector<14x1xf32>
    %17 = math.rsqrt %16 : vector<14x1xf32>
    %18 = vector.broadcast %17 : vector<14x1xf32> to vector<14x32xf32>
    %19 = arith.mulf %14, %18 : vector<14x32xf32>
    %c0_5 = arith.constant 0 : index
    %c0_6 = arith.constant 0 : index
    %20 = vector.load %arg2[%c0_5, %c0_6] : memref<1x32xf32, #tpu.memory_space<vmem>>, vector<1x32xf32>
    %21 = vector.broadcast %20 : vector<1x32xf32> to vector<14x32xf32>
    %22 = arith.mulf %19, %21 : vector<14x32xf32>
    %c0_7 = arith.constant 0 : index
    %c0_8 = arith.constant 0 : index
    %23 = vector.load %arg3[%c0_7, %c0_8] : memref<1x32xf32, #tpu.memory_space<vmem>>, vector<1x32xf32>
    %24 = vector.broadcast %23 : vector<1x32xf32> to vector<14x32xf32>
    %25 = arith.addf %22, %24 : vector<14x32xf32>
    %c0_9 = arith.constant 0 : index
    %c0_10 = arith.constant 0 : index
    %26 = vector.load %arg4[%c0_9, %c0_10] : memref<14x32xf32, #tpu.memory_space<vmem>>, vector<14x32xf32>
    tpu.vector_store %arg4[%c0_9, %c0_10], %25 {strides = array<i32>} : memref<14x32xf32, #tpu.memory_space<vmem>>, vector<14x32xf32>,
    return
  }
  func.func @transform_0(%arg0: i32) -> (i32, i32) {
    %c0_i32 = arith.constant 0 : i32
    %c0_i32_0 = arith.constant 0 : i32
    return %arg0, %c0_i32 : i32, i32
  }
  func.func @transform_1(%arg0: i32) -> (i32, i32) {
    %c0_i32 = arith.constant 0 : i32
    %c0_i32_0 = arith.constant 0 : i32
    %c0_i32_1 = arith.constant 0 : i32
    return %c0_i32, %c0_i32_0 : i32, i32
  }
  func.func @transform_2(%arg0: i32) -> (i32, i32) {
    %c0_i32 = arith.constant 0 : i32
    %c0_i32_0 = arith.constant 0 : i32
    %c0_i32_1 = arith.constant 0 : i32
    return %c0_i32, %c0_i32_0 : i32, i32
  }
  func.func @transform_3(%arg0: i32) -> (i32, i32) {
    %c0_i32 = arith.constant 0 : i32
    %c0_i32_0 = arith.constant 0 : i32
    return %arg0, %c0_i32 : i32, i32
  }
}

module attributes {stable_mosaic.version = 11 : i64} {
  func.func @_attn_out_ffn_kernel(%arg0: i32, %arg1: memref<4x14x8xbf16, #tpu.memory_space<vmem>>, %arg2: memref<14x32xbf16, #tpu.memory_space<vmem>>, %arg3: memref<14x1xf32, #tpu.memory_space<vmem>>, %arg4: memref<4x8x32xbf16, #tpu.memory_space<vmem>>, %arg5: memref<1x32xf32, #tpu.memory_space<vmem>>, %arg6: memref<1x32xf32, #tpu.memory_space<vmem>>, %arg7: memref<1x32xf32, #tpu.memory_space<vmem>>, %arg8: memref<32x64xbf16, #tpu.memory_space<vmem>>, %arg9: memref<1x64xf32, #tpu.memory_space<vmem>>, %arg10: memref<64x32xbf16, #tpu.memory_space<vmem>>, %arg11: memref<1x32xf32, #tpu.memory_space<vmem>>, %arg12: memref<14x32xbf16, #tpu.memory_space<vmem>>) attributes {dimension_semantics = [#tpu.dimension_semantics<parallel>], iteration_bounds = array<i64: 1>, scalar_prefetch = 0 : i64, scratch_operands = 0 : i64, tpu.core_type = #tpu.core_type<tc>, window_params = [{transform_indices = @transform_0, window_bounds = array<i64: 4, 14, 8>}, {transform_indices = @transform_1, window_bounds = array<i64: 14, 32>}, {transform_indices = @transform_2, window_bounds = array<i64: 14, 1>}, {pipeline_mode = #tpu.pipeline_mode<synchronous>, transform_indices = @transform_3, window_bounds = array<i64: 4, 8, 32>}, {pipeline_mode = #tpu.pipeline_mode<synchronous>, transform_indices = @transform_4, window_bounds = array<i64: 1, 32>}, {pipeline_mode = #tpu.pipeline_mode<synchronous>, transform_indices = @transform_5, window_bounds = array<i64: 1, 32>}, {pipeline_mode = #tpu.pipeline_mode<synchronous>, transform_indices = @transform_6, window_bounds = array<i64: 1, 32>}, {pipeline_mode = #tpu.pipeline_mode<synchronous>, transform_indices = @transform_7, window_bounds = array<i64: 32, 64>}, {pipeline_mode = #tpu.pipeline_mode<synchronous>, transform_indices = @transform_8, window_bounds = array<i64: 1, 64>}, {pipeline_mode = #tpu.pipeline_mode<synchronous>, transform_indices = @transform_9, window_bounds = array<i64: 64, 32>}, {pipeline_mode = #tpu.pipeline_mode<synchronous>, transform_indices = @transform_10, window_bounds = array<i64: 1, 32>}, {transform_indices = @transform_11, window_bounds = array<i64: 14, 32>}]} {
    %c0 = arith.constant 0 : index
    %c0_0 = arith.constant 0 : index
    %c0_1 = arith.constant 0 : index
    %0 = vector.load %arg1[%c0, %c0_0, %c0_1] : memref<4x14x8xbf16, #tpu.memory_space<vmem>>, vector<1x14x8xbf16>
    %1 = vector.shape_cast %0 : vector<1x14x8xbf16> to vector<14x8xbf16>
    %c0_2 = arith.constant 0 : index
    %c0_3 = arith.constant 0 : index
    %c0_4 = arith.constant 0 : index
    %2 = vector.load %arg4[%c0_2, %c0_3, %c0_4] : memref<4x8x32xbf16, #tpu.memory_space<vmem>>, vector<1x8x32xbf16>
    %3 = vector.shape_cast %2 : vector<1x8x32xbf16> to vector<8x32xbf16>
    %cst = arith.constant dense<0.000000e+00> : vector<14x32xf32>
    %4 = tpu.matmul %1, %3, %cst {dimension_numbers = #tpu.dot_dimension_numbers<[1], [0], [0], [1], [0, 0, 1, 1], [], []>} : vector<14x8xbf16>, vector<8x32xbf16>, vector<14x32xf32> -> vector<14x32xf32>
    %c1 = arith.constant 1 : index
    %c0_5 = arith.constant 0 : index
    %c0_6 = arith.constant 0 : index
    %5 = vector.load %arg1[%c1, %c0_5, %c0_6] : memref<4x14x8xbf16, #tpu.memory_space<vmem>>, vector<1x14x8xbf16>
    %6 = vector.shape_cast %5 : vector<1x14x8xbf16> to vector<14x8xbf16>
    %c1_7 = arith.constant 1 : index
    %c0_8 = arith.constant 0 : index
    %c0_9 = arith.constant 0 : index
    %7 = vector.load %arg4[%c1_7, %c0_8, %c0_9] : memref<4x8x32xbf16, #tpu.memory_space<vmem>>, vector<1x8x32xbf16>
    %8 = vector.shape_cast %7 : vector<1x8x32xbf16> to vector<8x32xbf16>
    %cst_10 = arith.constant dense<0.000000e+00> : vector<14x32xf32>
    %9 = tpu.matmul %6, %8, %cst_10 {dimension_numbers = #tpu.dot_dimension_numbers<[1], [0], [0], [1], [0, 0, 1, 1], [], []>} : vector<14x8xbf16>, vector<8x32xbf16>, vector<14x32xf32> -> vector<14x32xf32>
    %10 = arith.addf %4, %9 : vector<14x32xf32>
    %c2 = arith.constant 2 : index
    %c0_11 = arith.constant 0 : index
    %c0_12 = arith.constant 0 : index
    %11 = vector.load %arg1[%c2, %c0_11, %c0_12] : memref<4x14x8xbf16, #tpu.memory_space<vmem>>, vector<1x14x8xbf16>
    %12 = vector.shape_cast %11 : vector<1x14x8xbf16> to vector<14x8xbf16>
    %c2_13 = arith.constant 2 : index
    %c0_14 = arith.constant 0 : index
    %c0_15 = arith.constant 0 : index
    %13 = vector.load %arg4[%c2_13, %c0_14, %c0_15] : memref<4x8x32xbf16, #tpu.memory_space<vmem>>, vector<1x8x32xbf16>
    %14 = vector.shape_cast %13 : vector<1x8x32xbf16> to vector<8x32xbf16>
    %cst_16 = arith.constant dense<0.000000e+00> : vector<14x32xf32>
    %15 = tpu.matmul %12, %14, %cst_16 {dimension_numbers = #tpu.dot_dimension_numbers<[1], [0], [0], [1], [0, 0, 1, 1], [], []>} : vector<14x8xbf16>, vector<8x32xbf16>, vector<14x32xf32> -> vector<14x32xf32>
    %16 = arith.addf %10, %15 : vector<14x32xf32>
    %c3 = arith.constant 3 : index
    %c0_17 = arith.constant 0 : index
    %c0_18 = arith.constant 0 : index
    %17 = vector.load %arg1[%c3, %c0_17, %c0_18] : memref<4x14x8xbf16, #tpu.memory_space<vmem>>, vector<1x14x8xbf16>
    %18 = vector.shape_cast %17 : vector<1x14x8xbf16> to vector<14x8xbf16>
    %c3_19 = arith.constant 3 : index
    %c0_20 = arith.constant 0 : index
    %c0_21 = arith.constant 0 : index
    %19 = vector.load %arg4[%c3_19, %c0_20, %c0_21] : memref<4x8x32xbf16, #tpu.memory_space<vmem>>, vector<1x8x32xbf16>
    %20 = vector.shape_cast %19 : vector<1x8x32xbf16> to vector<8x32xbf16>
    %cst_22 = arith.constant dense<0.000000e+00> : vector<14x32xf32>
    %21 = tpu.matmul %18, %20, %cst_22 {dimension_numbers = #tpu.dot_dimension_numbers<[1], [0], [0], [1], [0, 0, 1, 1], [], []>} : vector<14x8xbf16>, vector<8x32xbf16>, vector<14x32xf32> -> vector<14x32xf32>
    %22 = arith.addf %16, %21 : vector<14x32xf32>
    %c0_23 = arith.constant 0 : index
    %c0_24 = arith.constant 0 : index
    %23 = vector.load %arg2[%c0_23, %c0_24] : memref<14x32xbf16, #tpu.memory_space<vmem>>, vector<14x32xbf16>
    %24 = arith.extf %23 : vector<14x32xbf16> to vector<14x32xf32>
    %25 = arith.addf %24, %22 : vector<14x32xf32>
    %c0_25 = arith.constant 0 : index
    %c0_26 = arith.constant 0 : index
    %26 = vector.load %arg5[%c0_25, %c0_26] : memref<1x32xf32, #tpu.memory_space<vmem>>, vector<1x32xf32>
    %27 = vector.broadcast %26 : vector<1x32xf32> to vector<14x32xf32>
    %28 = arith.addf %25, %27 : vector<14x32xf32>
    %cst_27 = arith.constant dense<0.000000e+00> : vector<14xf32>
    %29 = vector.multi_reduction <add>, %28, %cst_27 [1] : vector<14x32xf32> to vector<14xf32>
    %30 = vector.shape_cast %29 : vector<14xf32> to vector<14x1xf32>
    %cst_28 = arith.constant 3.200000e+01 : f32
    %31 = vector.broadcast %cst_28 : f32 to vector<14x1xf32>
    %32 = arith.divf %30, %31 : vector<14x1xf32>
    %33 = vector.broadcast %32 : vector<14x1xf32> to vector<14x32xf32>
    %34 = arith.subf %28, %33 : vector<14x32xf32>
    %35 = arith.mulf %34, %34 : vector<14x32xf32>
    %cst_29 = arith.constant dense<0.000000e+00> : vector<14xf32>
    %36 = vector.multi_reduction <add>, %35, %cst_29 [1] : vector<14x32xf32> to vector<14xf32>
    %37 = vector.shape_cast %36 : vector<14xf32> to vector<14x1xf32>
    %cst_30 = arith.constant 3.200000e+01 : f32
    %38 = vector.broadcast %cst_30 : f32 to vector<14x1xf32>
    %39 = arith.divf %37, %38 : vector<14x1xf32>
    %40 = vector.broadcast %32 : vector<14x1xf32> to vector<14x32xf32>
    %41 = arith.subf %28, %40 : vector<14x32xf32>
    %cst_31 = arith.constant 9.99999996E-13 : f32
    %42 = vector.broadcast %cst_31 : f32 to vector<14x1xf32>
    %43 = arith.addf %39, %42 : vector<14x1xf32>
    %44 = math.rsqrt %43 : vector<14x1xf32>
    %45 = vector.broadcast %44 : vector<14x1xf32> to vector<14x32xf32>
    %46 = arith.mulf %41, %45 : vector<14x32xf32>
    %c0_32 = arith.constant 0 : index
    %c0_33 = arith.constant 0 : index
    %47 = vector.load %arg6[%c0_32, %c0_33] : memref<1x32xf32, #tpu.memory_space<vmem>>, vector<1x32xf32>
    %48 = vector.broadcast %47 : vector<1x32xf32> to vector<14x32xf32>
    %49 = arith.mulf %46, %48 : vector<14x32xf32>
    %c0_34 = arith.constant 0 : index
    %c0_35 = arith.constant 0 : index
    %50 = vector.load %arg7[%c0_34, %c0_35] : memref<1x32xf32, #tpu.memory_space<vmem>>, vector<1x32xf32>
    %51 = vector.broadcast %50 : vector<1x32xf32> to vector<14x32xf32>
    %52 = arith.addf %49, %51 : vector<14x32xf32>
    %53 = arith.truncf %52 : vector<14x32xf32> to vector<14x32xbf16>
    %c0_36 = arith.constant 0 : index
    %c0_37 = arith.constant 0 : index
    %54 = vector.load %arg8[%c0_36, %c0_37] : memref<32x64xbf16, #tpu.memory_space<vmem>>, vector<32x64xbf16>
    %cst_38 = arith.constant dense<0.000000e+00> : vector<14x64xf32>
    %55 = tpu.matmul %53, %54, %cst_38 {dimension_numbers = #tpu.dot_dimension_numbers<[1], [0], [0], [1], [0, 0, 1, 1], [], []>} : vector<14x32xbf16>, vector<32x64xbf16>, vector<14x64xf32> -> vector<14x64xf32>
    %c0_39 = arith.constant 0 : index
    %c0_40 = arith.constant 0 : index
    %56 = vector.load %arg9[%c0_39, %c0_40] : memref<1x64xf32, #tpu.memory_space<vmem>>, vector<1x64xf32>
    %57 = vector.broadcast %56 : vector<1x64xf32> to vector<14x64xf32>
    %58 = arith.addf %55, %57 : vector<14x64xf32>
    %cst_41 = arith.constant 0.000000e+00 : f32
    %59 = vector.broadcast %cst_41 : f32 to vector<14x64xf32>
    %60 = arith.maximumf %58, %59 : vector<14x64xf32>
    %61 = arith.truncf %60 : vector<14x64xf32> to vector<14x64xbf16>
    %c0_42 = arith.constant 0 : index
    %c0_43 = arith.constant 0 : index
    %62 = vector.load %arg10[%c0_42, %c0_43] : memref<64x32xbf16, #tpu.memory_space<vmem>>, vector<64x32xbf16>
    %cst_44 = arith.constant dense<0.000000e+00> : vector<14x32xf32>
    %63 = tpu.matmul %61, %62, %cst_44 {dimension_numbers = #tpu.dot_dimension_numbers<[1], [0], [0], [1], [0, 0, 1, 1], [], []>} : vector<14x64xbf16>, vector<64x32xbf16>, vector<14x32xf32> -> vector<14x32xf32>
    %c0_45 = arith.constant 0 : index
    %c0_46 = arith.constant 0 : index
    %64 = vector.load %arg11[%c0_45, %c0_46] : memref<1x32xf32, #tpu.memory_space<vmem>>, vector<1x32xf32>
    %65 = vector.broadcast %64 : vector<1x32xf32> to vector<14x32xf32>
    %66 = arith.addf %63, %65 : vector<14x32xf32>
    %67 = arith.addf %28, %66 : vector<14x32xf32>
    %c0_47 = arith.constant 0 : index
    %c0_48 = arith.constant 0 : index
    %68 = vector.load %arg3[%c0_47, %c0_48] : memref<14x1xf32, #tpu.memory_space<vmem>>, vector<14x1xf32>
    %69 = vector.broadcast %68 : vector<14x1xf32> to vector<14x32xf32>
    %70 = arith.mulf %67, %69 : vector<14x32xf32>
    %71 = arith.truncf %70 : vector<14x32xf32> to vector<14x32xbf16>
    %c0_49 = arith.constant 0 : index
    %c0_50 = arith.constant 0 : index
    %72 = vector.load %arg12[%c0_49, %c0_50] : memref<14x32xbf16, #tpu.memory_space<vmem>>, vector<14x32xbf16>
    tpu.vector_store %arg12[%c0_49, %c0_50], %71 {strides = array<i32>} : memref<14x32xbf16, #tpu.memory_space<vmem>>, vector<14x32xbf16>,
    return
  }
  func.func @transform_0(%arg0: i32) -> (i32, i32, i32) {
    %c0_i32 = arith.constant 0 : i32
    %c0_i32_0 = arith.constant 0 : i32
    %c0_i32_1 = arith.constant 0 : i32
    return %c0_i32, %arg0, %c0_i32_0 : i32, i32, i32
  }
  func.func @transform_1(%arg0: i32) -> (i32, i32) {
    %c0_i32 = arith.constant 0 : i32
    %c0_i32_0 = arith.constant 0 : i32
    return %arg0, %c0_i32 : i32, i32
  }
  func.func @transform_2(%arg0: i32) -> (i32, i32) {
    %c0_i32 = arith.constant 0 : i32
    %c0_i32_0 = arith.constant 0 : i32
    return %arg0, %c0_i32 : i32, i32
  }
  func.func @transform_3(%arg0: i32) -> (i32, i32, i32) {
    %c0_i32 = arith.constant 0 : i32
    %c0_i32_0 = arith.constant 0 : i32
    %c0_i32_1 = arith.constant 0 : i32
    %c0_i32_2 = arith.constant 0 : i32
    return %c0_i32, %c0_i32_0, %c0_i32_1 : i32, i32, i32
  }
  func.func @transform_4(%arg0: i32) -> (i32, i32) {
    %c0_i32 = arith.constant 0 : i32
    %c0_i32_0 = arith.constant 0 : i32
    %c0_i32_1 = arith.constant 0 : i32
    return %c0_i32, %c0_i32_0 : i32, i32
  }
  func.func @transform_5(%arg0: i32) -> (i32, i32) {
    %c0_i32 = arith.constant 0 : i32
    %c0_i32_0 = arith.constant 0 : i32
    %c0_i32_1 = arith.constant 0 : i32
    return %c0_i32, %c0_i32_0 : i32, i32
  }
  func.func @transform_6(%arg0: i32) -> (i32, i32) {
    %c0_i32 = arith.constant 0 : i32
    %c0_i32_0 = arith.constant 0 : i32
    %c0_i32_1 = arith.constant 0 : i32
    return %c0_i32, %c0_i32_0 : i32, i32
  }
  func.func @transform_7(%arg0: i32) -> (i32, i32) {
    %c0_i32 = arith.constant 0 : i32
    %c0_i32_0 = arith.constant 0 : i32
    %c0_i32_1 = arith.constant 0 : i32
    return %c0_i32, %c0_i32_0 : i32, i32
  }
  func.func @transform_8(%arg0: i32) -> (i32, i32) {
    %c0_i32 = arith.constant 0 : i32
    %c0_i32_0 = arith.constant 0 : i32
    %c0_i32_1 = arith.constant 0 : i32
    return %c0_i32, %c0_i32_0 : i32, i32
  }
  func.func @transform_9(%arg0: i32) -> (i32, i32) {
    %c0_i32 = arith.constant 0 : i32
    %c0_i32_0 = arith.constant 0 : i32
    %c0_i32_1 = arith.constant 0 : i32
    return %c0_i32, %c0_i32_0 : i32, i32
  }
  func.func @transform_10(%arg0: i32) -> (i32, i32) {
    %c0_i32 = arith.constant 0 : i32
    %c0_i32_0 = arith.constant 0 : i32
    %c0_i32_1 = arith.constant 0 : i32
    return %c0_i32, %c0_i32_0 : i32, i32
  }
  func.func @transform_11(%arg0: i32) -> (i32, i32) {
    %c0_i32 = arith.constant 0 : i32
    %c0_i32_0 = arith.constant 0 : i32
    return %arg0, %c0_i32 : i32, i32
  }
}

</mosaic_0001>

<bundles_post_ra>
// kernel: tpu_custom_call.1
= control target key start
LH: loop header
LB: loop body
LE: loop exit
PB: predicated region body
PF: predicated region fallthrough
CT: control target
= control target key end

     0   :  { %7 = vsyncpa [#allocation3], 0  ;;  %s690_s0 = inlined_call_operand.hbm [shape: f32[16,128], index: 0, kind: input, shape index: {}]   ;;  %s691_s1 = inlined_call_operand.hbm [shape: f32[8,128], index: 1, kind: input, shape index: {}]   ;;  %s692_s2 = inlined_call_operand.hbm [shape: f32[16,128], index: 2, kind: output, shape index: {}]  }
   0x1   :  { %9 = vsyncpa [#allocation3 + $0x1], 0 }
   0x2   :  { %10 = vsyncpa [#allocation6], 0 }
   0x3   :  { %11 = vsyncpa [#allocation4], 0 }
   0x4   :  { %13 = vsyncpa [#allocation4 + $0x1], 0  ;;  %s489_s9 = smov 0   ;;  %s491_s10 = smov 0  }
   0x5   :  { %s493_s11 = smov 0   ;;  %s495_s12 = smov 0  }
   0x6 LB: > { %s510_s13 = sadd.s32 4294967295, %s469_s12   ;;  %s270_s14 = sadd.s32 4294967294, %s469_s12   ;;  %s469_s12 = sphi %s495_s12, %s716_s12   ;;  %s465_s11 = sphi %s493_s11, %s715_s11   ;;  %s461_s10 = sphi %s491_s10, %s714_s10   ;;  %s457_s9 = sphi %s489_s9, %s713_s9  }
   0x7   : > { %p39_p0 = scmp.ne.s32.totalorder %s461_s10, %s457_s9  ;;  %p693_p1 = scmp.eq.s32.totalorder %s510_s13, 0 }
   0x8   : > { %p90_p3 = scmp.eq.s32.totalorder %s270_s14, 1  ;;  %p271_p5 = scmp.ge.s32.totalorder %s469_s12, 1 }
   0x9   : > { %p519_p4 = por %p693_p1, %p39_p0  ;;  %p97_p7 = scmp.lt.s32.totalorder %s469_s12, 3 }
   0xa   : > { %p524_p6 = por %p90_p3, %p39_p0  ;;  %s471_s18 = smov [#allocation5]  }
   0xb   : > { %s696_s15 = scalar_select %p519_p4, 1, 0 }
   0xc   : > { %s697_s16 = scalar_select %p524_p6, 1, 0 }
   0xd   : > { %p529_p8 = pnand %p271_p5, %p97_p7  ;;  %s110_s19 = sshll.u32 %s471_s18, 4  ;;  %s111_s19 = int_to_ptr.vmem [resolvable:$true] %s110_s19 }
   0xe   : > { %s537_s20 = sadd.s32 1, %s469_s12   ;;  %s26_s24 = sadd.s32 1, %s465_s11 }
   0xf   : > { %s698_s17 = scalar_select %p529_p8, 1, 0 }
  0x10   : > { %p292_p10 = pneg %p529_p8  ;;  %s23_s22 = ssub.s32 %s469_s12, %s537_s20 }
  0x11   : > { %p547_p12 = scmp.eq.s32.totalorder %s23_s22, 0  ;;  %s341_s27 = scalar_lea.hbm %s691_s1, 128 }
  0x12   : > { %p541_p11 = pnand %p292_p10, %p693_p1  ;;  %p342_p0 = scmp.ne.s32.totalorder %s691_s1, %s341_s27 }
  0x13   : > { %s700_s23 = scalar_select %p547_p12, 1, 0 }
  0x14   : > { %p343_p3 = pneg %p541_p11  ;;  %p348_p10 = scmp.lt.u32.totalorder %s341_s27, %s691_s1 }
  0x16   : > { %p344_p5 = pnand %p343_p3, %p342_p0 }
  0x18   : > { %p345_p7 = pneg %p344_p5 }
  0x1a   : > { %p350_p9 = pnand %p348_p10, %p345_p7 }
  0x1c   : > { %353 = shalt.err (!%p350_p9)
}
  0x1d   : > { %s354_s4 = scalar_lea.vmem %s111_s19, 128  ;;  %p362_p6 = scmp.lt.s32.totalorder %s111_s19, %s111_s19 }
  0x1e   : > { %p355_p1 = scmp.ne.s32.totalorder %s111_s19, %s354_s4  ;;  %p363_p4 = scmp.lt.s32.totalorder %s354_s4, %s354_s4 }
  0x20   : > { %p357_p2 = pnand %p355_p1, %p343_p3  ;;  %p364_p8 = por %p363_p4, %p362_p6 }
  0x22   : > { %p358_p13 = pneg %p357_p2 }
  0x24   : > { %p365_p12 = pnand %p364_p8, %p358_p13 }
  0x26   : > { %368 = shalt.err (!%p365_p12)
}
  0x27   : > { %295 = dma.hbm_to_vmem [thread:$0]  (!%p541_p11), %s691_s1, 128, %s111_s19, [#allocation6]  }
  0x28   : > { %p701_p1 = scmp.ne.s32.totalorder %s700_s23, 0  ;;  %p34_p2 = scmp.eq.s32.totalorder %s469_s12, 0 }
  0x29   : > { %p702_p4 = scmp.ne.s32.totalorder %s465_s11, %s461_s10  ;;  %p703_p6 = scmp.eq.s32.totalorder %s510_s13, 1 }
  0x2a   : > { %s573_s7 = scalar_select %p701_p1, %s465_s11, %s26_s24  }
  0x2b   : > { %p581_p8 = por %p703_p6, %p702_p4  ;;  %p305_p9 = scmp.lt.s32.totalorder %s469_s12, 2 }
  0x2c   : > { %s121_s14 = sand.u32 1, %s465_s11   ;;  %p705_p12 = pmov %p702_p4 }
  0x2d   : > { %s274_s18 = sshll.u32 %s121_s14, 3  ;;  %s275_s21 = sshll.u32 %s469_s12, 7 }
  0x2e   : > { %p35_p13 = por %p34_p2, %p705_p12  ;;  %s594_s19 = scalar_lea.hbm %s690_s0, %s275_s21 }
  0x2f   : > { %s125_s23 = scalar_lea.vmem [#allocation2], %s274_s18  ;;  %s122_s27 = scalar_lea.sflag [#allocation3], %s121_s14 }
  0x30   : > { %s132_s24 = sshll.u32 %s125_s23, 4  ;;  %p596_p11 = pnand %p305_p9, %p35_p13  ;;  %s600_s24 = int_to_ptr.vmem [resolvable:$true] %s132_s24 }
  0x31   : > { %s369_s28 = scalar_lea.hbm %s594_s19, 128  ;;  %s374_s3 = scalar_lea.hbm %s690_s0, 256 }
  0x32   : > { %p370_p0 = scmp.ne.s32.totalorder %s594_s19, %s369_s28  ;;  %p371_p3 = pneg %p596_p11 }
  0x33   : > { %p375_p10 = scmp.lt.u32.totalorder %s594_s19, %s690_s0  ;;  %p376_p1 = scmp.lt.u32.totalorder %s374_s3, %s369_s28 }
  0x34   : > { %p372_p5 = pnand %p371_p3, %p370_p0  ;;  %p378_p4 = scmp.lt.u32.totalorder %s369_s28, %s594_s19 }
  0x35   : > { %p377_p2 = por %p376_p1, %p375_p10 }
  0x36   : > { %p373_p7 = pneg %p372_p5 }
  0x37   : > { %p379_p6 = por %p378_p4, %p377_p2 }
  0x39   : > { %p380_p9 = pnand %p379_p6, %p373_p7 }
  0x3b   : > { %383 = shalt.err (!%p380_p9)
}
  0x3c   : > { %s384_s6 = scalar_lea.vmem %s600_s24, 128  ;;  %s472_s14 = smov [#allocation2]  }
  0x3d   : > { %p385_p12 = scmp.ne.s32.totalorder %s600_s24, %s384_s6  ;;  %s389_s18 = sshll.u32 %s472_s14, 4  ;;  %s390_s18 = int_to_ptr.vmem [resolvable:$false] %s389_s18 }
  0x3e   : > { %s391_s21 = scalar_lea.vmem %s390_s18, 256  ;;  %p392_p5 = scmp.lt.s32.totalorder %s600_s24, %s390_s18 }
  0x3f   : > { %p387_p13 = pnand %p385_p12, %p371_p3  ;;  %p393_p10 = scmp.lt.s32.totalorder %s391_s21, %s384_s6 }
  0x41   : > { %p388_p0 = pneg %p387_p13  ;;  %p394_p1 = por %p393_p10, %p392_p5 }
  0x43   : > { %p395_p2 = pnand %p394_p1, %p388_p0 }
  0x45   : > { %398 = shalt.err (!%p395_p2)
}
  0x46   : > { %299 = dma.hbm_to_vmem [thread:$0]  (!%p596_p11), %s594_s19, 128, %s600_s24, %s122_s27  }
  0x47   : > { %p707_p7 = scmp.ne.s32.totalorder %s698_s17, 0 }
  0x48   : > { %s630_s22 = sand.u32 (!%p707_p7), 1, %s461_s10   ;;  %p708_p3 = scmp.ne.s32.totalorder (!%p707_p7), %s696_s15, 0 }
  0x49   : > { %141 = sbr.rel (%p707_p7) target bundleno = 109 (0x6d), region = 28  ;;  %s277_s25 = sshll.u32 (!%p707_p7), %s630_s22, 3 }
  0x4a   : > { %s144_s23 = scalar_lea.sflag (!%p707_p7), [#allocation3], %s630_s22  ;;  %s147_s28 = scalar_lea.vmem (!%p707_p7), [#allocation2], %s277_s25 }
  0x50   : > { %444 = dma.done.wait (%p708_p3), %s144_s23, 128  }
  0x51   : > { %446 = vsyncadd (%p708_p3), %s144_s23, 4294967168  ;;  %p709_p4 = scmp.eq.s32.totalorder %s510_s13, 0 }
  0x53   : > { %448 = dma.done.wait (%p709_p4), [#allocation6], 128   ;;  %p710_p11 = pmov %p709_p4 }
  0x54   : > { %s171_s17 = scalar_lea.vmem [#allocation7], %s277_s25  ;;  %s281_s24 = sshll.u32 %s510_s13, 7  ;;  %v172_v0 = vld [vmem:[%s147_s28] sm:$0xff]  ;;  %v173_v1 = vld [vmem:[#allocation5] sm:$0xff] }
  0x55   : > { %450 = vsyncadd (%p710_p11), [#allocation6], 4294967168  ;;  %s190_s19 = sshll.u32 %s171_s17, 4  ;;  %v174_v2 = vadd.f32 %v173_v1, %v172_v0  ;;  %s648_s27 = scalar_lea.hbm %s692_s2, %s281_s24  ;;  %s643_s19 = int_to_ptr.vmem [resolvable:$true] %s190_s19 }
  0x56   : > { %s177_s29 = scalar_lea.sflag [#allocation4], %s630_s22  ;;  %s399_s30 = scalar_lea.vmem %s643_s19, 128 }
  0x57   : > { %175 = vst [vmem:[%s171_s17] sm:$0xff] %v174_v2  ;;  %p400_p6 = scmp.ne.s32.totalorder %s643_s19, %s399_s30  ;;  %s473_s13 = smov [#allocation7]  }
  0x58   : > { %s403_s3 = sshll.u32 %s473_s13, 4  ;;  %s404_s3 = int_to_ptr.vmem [resolvable:$false] %s403_s3 }
  0x59   : > { %p401_p9 = pnand %p400_p6, %p581_p8  ;;  %s405_s4 = scalar_lea.vmem %s404_s3, 256 }
  0x5a   : > { %p406_p13 = scmp.lt.s32.totalorder %s643_s19, %s404_s3  ;;  %p407_p0 = scmp.lt.s32.totalorder %s405_s4, %s399_s30 }
  0x5b   : > { %p402_p12 = pneg %p401_p9 }
  0x5c   : > { %p408_p5 = por %p407_p0, %p406_p13 }
  0x5e   : > { %p409_p10 = pnand %p408_p5, %p402_p12 }
  0x60   : > { %412 = shalt.err (!%p409_p10)
}
  0x61   : > { %s413_s5 = scalar_lea.hbm %s648_s27, 128  ;;  %s417_s18 = scalar_lea.hbm %s692_s2, 256 }
  0x62   : > { %p414_p1 = scmp.ne.s32.totalorder %s648_s27, %s413_s5  ;;  %p418_p3 = scmp.lt.u32.totalorder %s648_s27, %s692_s2 }
  0x63   : > { %p419_p4 = scmp.lt.u32.totalorder %s417_s18, %s413_s5  ;;  %p421_p6 = scmp.lt.u32.totalorder %s413_s5, %s648_s27 }
  0x64   : > { %p415_p2 = pnand %p414_p1, %p581_p8 }
  0x65   : > { %p420_p11 = por %p419_p4, %p418_p3 }
  0x66   : > { %p416_p7 = pneg %p415_p2 }
  0x67   : > { %p422_p9 = por %p421_p6, %p420_p11 }
  0x69   : > { %p423_p12 = pnand %p422_p9, %p416_p7 }
  0x6b   : > { %426 = shalt.err (!%p423_p12)
}
  0x6c   : > { %290 = dma.vmem_to_hbm [thread:$0]  (%p581_p8), %s643_s19, 128, %s648_s27, %s177_s29  }
  0x6d PF: > { %s202_s25 = sand.u32 1, %s457_s9   ;;  %p711_p13 = scmp.ne.s32.totalorder %s697_s16, 0 }
  0x6e   : > { %p712_p0 = scmp.ge.s32.totalorder %s469_s12, 2  ;;  %s203_s23 = scalar_lea.sflag [#allocation4], %s202_s25 }
  0x70   : > { %p301_p5 = pnand %p712_p0, %p711_p13 }
  0x72   : > { %452 = dma.done.wait (!%p301_p5), %s203_s23, 128  }
  0x73   : > { %454 = vsyncadd (!%p301_p5), %s203_s23, 4294967168  ;;  %p16_p10 = scmp.ge.s32.totalorder %s537_s20, 4   ;;  %s713_s9 = smov %s461_s10 }
  0x74   : > { %s714_s10 = smov %s465_s11  ;;  %s715_s11 = smov %s573_s7 }
  0x75   : > { %s716_s12 = smov %s537_s20  ;;  %18 = sbr.rel (!%p16_p10) target bundleno = 6 (0x6), region = 77 }
  0x7c   :  { %208 = vsyncpa [#allocation3], 1 }
  0x7d   :  { %210 = vsyncpa [#allocation3 + $0x1], 1 }
  0x7e   :  { %211 = vsyncpa [#allocation6], 1 }
  0x7f   :  { %212 = vsyncpa [#allocation4], 1 }
  0x80   :  { %214 = vsyncpa [#allocation4 + $0x1], 1 }

// kernel: transformer_encoder_forward.10
= control target key start
LH: loop header
LB: loop body
LE: loop exit
PB: predicated region body
PF: predicated region fallthrough
CT: control target
= control target key end

     0   :  { %vm113_vm0 = vcmask 1043456   ;;  %vm114_vm1 = vcmask 1044480   ;;  %v552_v1 = vmov 65535   ;;  %vm70_vm2 = vcmask 72704   ;;  %s810_s1 = inlined_call_operand.vmem [shape: bf16[9,32], index: 1, kind: input, shape index: {}]   ;;  %s811_s0 = inlined_call_operand.vmem [shape: f32[210,9], index: 0, kind: input, shape index: {}]   ;;  %s812_s2 = inlined_call_operand.vmem [shape: f32[1,32], index: 2, kind: input, shape index: {}]   ;;  %s813_s3 = inlined_call_operand.vmem [shape: bf16[210,32], index: 3, kind: output, shape index: {}]  }
   0x1   :  { %v551_v0 = vld [vmem:[%s810_s1] sm:$0x1f]   ;;  %v115_v2 = vsel %vm113_vm0, 4294967295, %v552_v1  ;;  %v16_v4 = vld [vmem:[%s811_s0 + $0x8] sm:$0xff]  ;;  %v17_v5 = vld [vmem:[%s811_s0 + $0x10] sm:$0xff]  ;;  %vm400_vm3 = vcmask 257024  }
   0x2   :  { %v15_v3 = vld [vmem:[%s811_s0] sm:$0xff]  ;;  %v116_v6 = vsel %vm114_vm1, %v115_v2, 0  ;;  %v18_v8 = vld [vmem:[%s811_s0 + $0x18] sm:$0xff]  ;;  %v32_v10 = vld [vmem:[%s811_s0 + $0x88] sm:$0xff]  ;;  %vm427_vm4 = vcmask 253952  }
   0x3   :  { %v42_v7 = vpack.c.bf16 %v16_v4, %v15_v3  ;;  %v31_v9 = vld [vmem:[%s811_s0 + $0x80] sm:$0xff]  ;;  %v118_v11 = vand.u32 %v551_v0, %v116_v6  ;;  %v33_v13 = vld [vmem:[%s811_s0 + $0x90] sm:$0xff]  ;;  %v34_v14 = vld [vmem:[%s811_s0 + $0x98] sm:$0xff]  ;;  %v43_v17 = vpack.c.bf16 %v18_v8, %v17_v5 }
   0x4   :  { %v50_v12 = vpack.c.bf16 %v32_v10, %v31_v9  ;;  %v19_v15 = vld [vmem:[%s811_s0 + $0x20] sm:$0xff]  ;;  %v20_v16 = vld [vmem:[%s811_s0 + $0x28] sm:$0xff]  ;;  %v51_v18 = vpack.c.bf16 %v34_v14, %v33_v13  ;;  %v21_v23 = vld [vmem:[%s811_s0 + $0x30] sm:$0xff] }
   0x5   :  { %520 = vmatprep.mubr.msk.bf16.mxu0 %vm70_vm2, %v42_v7  ;;  %518 = vmatprep.subr.bf16.mxu0 %v118_v11  ;;  %v35_v19 = vld [vmem:[%s811_s0 + $0xa0] sm:$0xff]  ;;  %v36_v20 = vld [vmem:[%s811_s0 + $0xa8] sm:$0xff]  ;;  %v44_v21 = vpack.c.bf16 %v20_v16, %v19_v15  ;;  %v22_v24 = vld [vmem:[%s811_s0 + $0x38] sm:$0xff] }
   0x6   :  { %548 = vmatprep.subr.bf16.mxu1 %v118_v11  ;;  %519 = vmatpush3.bf16.msra.mxu0 %v118_v11  ;;  %v52_v22 = vpack.c.bf16 %v36_v20, %v35_v19  ;;  %v37_v25 = vld [vmem:[%s811_s0 + $0xb0] sm:$0xff]  ;;  %v38_v26 = vld [vmem:[%s811_s0 + $0xb8] sm:$0xff]  ;;  %v23_v27 = vld [vmem:[%s811_s0 + $0x40] sm:$0xff]  ;;  %v45_v31 = vpack.c.bf16 %v22_v24, %v21_v23 }
   0x7   :  { %549 = vmatpush3.bf16.msra.mxu1 %v118_v11  ;;  %536 = vmatprep.mubr.msk.bf16.mxu1 %vm70_vm2, %v50_v12  ;;  %v24_v28 = vld [vmem:[%s811_s0 + $0x48] sm:$0xff]  ;;  %v39_v29 = vld [vmem:[%s811_s0 + $0xc0] sm:$0xff]  ;;  %v53_v32 = vpack.c.bf16 %v38_v26, %v37_v25  ;;  %v25_v35 = vld [vmem:[%s811_s0 + $0x50] sm:$0xff] }
   0x8   :  { %v40_v30 = vld [vmem:[%s811_s0 + $0xc8] sm:$0xff]  ;;  %v46_v33 = vpack.c.bf16 %v24_v28, %v23_v27  ;;  %v26_v36 = vld [vmem:[%s811_s0 + $0x58] sm:$0xff]  ;;  %v41_v37 = vld [vmem:[%s811_s0 + $0xd0] sm:$0x3] }
   0x9   :  { %521 = vmatmul.mubr.msk.bf16.vlgmr.msra.gmra.mrb[0].mxu0 %vm70_vm2, %v43_v17  ;;  %v54_v34 = vpack.c.bf16 %v40_v30, %v39_v29  ;;  %v27_v38 = vld [vmem:[%s811_s0 + $0x60] sm:$0xff]  ;;  %v28_v39 = vld [vmem:[%s811_s0 + $0x68] sm:$0xff]  ;;  %v47_v40 = vpack.c.bf16 %v26_v36, %v25_v35  ;;  %v55_v41 = vpack.c.bf16 %v41_v37, %v41_v37  ;;  %v29_v43 = vld [vmem:[%s811_s0 + $0x70] sm:$0xff] }
   0xa   :  { %537 = vmatmul.mubr.msk.bf16.vlgmr.msra.gmra.mrb[0].mxu1 %vm70_vm2, %v51_v18  ;;  %524 = vmatprep.mubr.msk.bf16.mxu0 %vm70_vm2, %v44_v21  ;;  %v48_v42 = vpack.c.bf16 %v28_v39, %v27_v38  ;;  %v30_v44 = vld [vmem:[%s811_s0 + $0x78] sm:$0xff]  ;;  %v674_v46 = vld [vmem:[%s812_s2] ss:$0 sm:$0xff] }
   0xb   :  { %540 = vmatprep.mubr.msk.bf16.mxu1 %vm70_vm2, %v52_v22  ;;  %v49_v45 = vpack.c.bf16 %v30_v44, %v29_v43 }
  0x11   :  { %525 = vmatmul.mubr.msk.bf16.gmra.mrb[4].mxu0 %vm70_vm2, %v45_v31 }
  0x12   :  { %541 = vmatmul.mubr.msk.bf16.gmra.mrb[4].mxu1 %vm70_vm2, %v53_v32  ;;  %528 = vmatprep.mubr.msk.bf16.mxu0 %vm70_vm2, %v46_v33 }
  0x13   :  { %544 = vmatprep.mubr.msk.bf16.mxu1 %vm70_vm2, %v54_v34 }
  0x19   :  { %529 = vmatmul.mubr.msk.bf16.gmra.mrb[8].mxu0 %vm70_vm2, %v47_v40 }
  0x1a   :  { %545 = vmatmul.mubr.msk.bf16.gmra.mrb[8].mxu1 %vm70_vm2, %v55_v41  ;;  %532 = vmatprep.mubr.msk.bf16.mxu0 %vm70_vm2, %v48_v42 }
  0x21   :  { %533 = vmatmul.mubr.msk.bf16.gmra.mrb[12].mxu0 %vm70_vm2, %v49_v45 }
  0xdc   :  { %v522_v47 = vpop.f32.mrb[0].mxu0 }
  0xdd   :  { %v538_v48 = vpop.f32.mrb[0].mxu1  ;;  %v163_v49 = vadd.f32 %v522_v47, %v674_v46  ;;  %v154_v50 = vpop.f32.mrb[1].mxu0 }
  0xde   :  { %v227_v51 = vadd.f32 %v538_v48, %v674_v46  ;;  %v218_v52 = vpop.f32.mrb[1].mxu1  ;;  %v155_v53 = vadd.f32 %v674_v46, %v154_v50  ;;  %v523_v54 = vpop.f32.mrb[2].mxu0 }
  0xdf   :  { %v219_v55 = vadd.f32 %v674_v46, %v218_v52  ;;  %v539_v56 = vpop.f32.mrb[2].mxu1  ;;  %v266_v57 = vmax.f32 %v163_v49, 0.0  ;;  %v166_v58 = vadd.f32 %v523_v54, %v674_v46  ;;  %v157_v59 = vpop.f32.mrb[3].mxu0 }
  0xe0   :  { %v282_v60 = vmax.f32 %v227_v51, 0.0  ;;  %v230_v61 = vadd.f32 %v539_v56, %v674_v46  ;;  %v221_v62 = vpop.f32.mrb[3].mxu1  ;;  %v264_v63 = vmax.f32 %v155_v53, 0.0  ;;  %v158_v0 = vadd.f32 %v674_v46, %v157_v59 }
  0xe1   :  { %v280_v1 = vmax.f32 %v219_v55, 0.0  ;;  %v222_v2 = vadd.f32 %v674_v46, %v221_v62  ;;  %v478_v3 = vpack.c.bf16 %v266_v57, %v266_v57  ;;  %v267_v4 = vmax.f32 %v166_v58, 0.0 }
  0xe2   :  { %v494_v5 = vpack.c.bf16 %v282_v60, %v282_v60  ;;  %v283_v6 = vmax.f32 %v230_v61, 0.0  ;;  %v476_v7 = vpack.c.bf16 %v264_v63, %v264_v63  ;;  %v265_v8 = vmax.f32 %v158_v0, 0.0 }
  0xe3   :  { %v492_v9 = vpack.c.bf16 %v280_v1, %v280_v1  ;;  %v281_v10 = vmax.f32 %v222_v2, 0.0  ;;  %403 = vst.msk [vmem:[%s813_s3 + $0x8] sm:$0xf] %vm400_vm3, %v478_v3  ;;  %v479_v11 = vpack.c.bf16 %v267_v4, %v267_v4 }
  0xe4   :  { %419 = vst.msk [vmem:[%s813_s3 + $0x48] sm:$0xf] %vm400_vm3, %v494_v5  ;;  %v495_v12 = vpack.c.bf16 %v283_v6, %v283_v6  ;;  %401 = vst.msk [vmem:[%s813_s3] sm:$0xf] %vm400_vm3, %v476_v7  ;;  %v477_v13 = vpack.c.bf16 %v265_v8, %v265_v8  ;;  %v526_v14 = vpop.f32.mrb[4].mxu0 }
  0xe5   :  { %417 = vst.msk [vmem:[%s813_s3 + $0x40] sm:$0xf] %vm400_vm3, %v492_v9  ;;  %v493_v15 = vpack.c.bf16 %v281_v10, %v281_v10  ;;  %v542_v16 = vpop.f32.mrb[4].mxu1  ;;  %404 = vst.msk [vmem:[%s813_s3 + $0xc] sm:$0xf] %vm400_vm3, %v479_v11  ;;  %v179_v17 = vadd.f32 %v526_v14, %v674_v46  ;;  %v170_v18 = vpop.f32.mrb[5].mxu0 }
  0xe6   :  { %420 = vst.msk [vmem:[%s813_s3 + $0x4c] sm:$0xf] %vm400_vm3, %v495_v12  ;;  %v243_v19 = vadd.f32 %v542_v16, %v674_v46  ;;  %v234_v20 = vpop.f32.mrb[5].mxu1  ;;  %402 = vst.msk [vmem:[%s813_s3 + $0x4] sm:$0xf] %vm400_vm3, %v477_v13  ;;  %v171_v21 = vadd.f32 %v674_v46, %v170_v18  ;;  %v527_v22 = vpop.f32.mrb[6].mxu0 }
  0xe7   :  { %418 = vst.msk [vmem:[%s813_s3 + $0x44] sm:$0xf] %vm400_vm3, %v493_v15  ;;  %v235_v23 = vadd.f32 %v674_v46, %v234_v20  ;;  %v543_v24 = vpop.f32.mrb[6].mxu1  ;;  %v270_v25 = vmax.f32 %v179_v17, 0.0  ;;  %v182_v26 = vadd.f32 %v527_v22, %v674_v46  ;;  %v173_v27 = vpop.f32.mrb[7].mxu0 }
  0xe8   :  { %v286_v28 = vmax.f32 %v243_v19, 0.0  ;;  %v246_v29 = vadd.f32 %v543_v24, %v674_v46  ;;  %v237_v30 = vpop.f32.mrb[7].mxu1  ;;  %v268_v31 = vmax.f32 %v171_v21, 0.0  ;;  %v174_v32 = vadd.f32 %v674_v46, %v173_v27 }
  0xe9   :  { %v284_v33 = vmax.f32 %v235_v23, 0.0  ;;  %v238_v34 = vadd.f32 %v674_v46, %v237_v30  ;;  %v482_v35 = vpack.c.bf16 %v270_v25, %v270_v25  ;;  %v271_v36 = vmax.f32 %v182_v26, 0.0 }
  0xea   :  { %v498_v37 = vpack.c.bf16 %v286_v28, %v286_v28  ;;  %v287_v38 = vmax.f32 %v246_v29, 0.0  ;;  %v480_v39 = vpack.c.bf16 %v268_v31, %v268_v31  ;;  %v269_v40 = vmax.f32 %v174_v32, 0.0 }
  0xeb   :  { %v496_v41 = vpack.c.bf16 %v284_v33, %v284_v33  ;;  %v285_v42 = vmax.f32 %v238_v34, 0.0  ;;  %407 = vst.msk [vmem:[%s813_s3 + $0x18] sm:$0xf] %vm400_vm3, %v482_v35  ;;  %v483_v43 = vpack.c.bf16 %v271_v36, %v271_v36 }
  0xec   :  { %423 = vst.msk [vmem:[%s813_s3 + $0x58] sm:$0xf] %vm400_vm3, %v498_v37  ;;  %v499_v44 = vpack.c.bf16 %v287_v38, %v287_v38  ;;  %405 = vst.msk [vmem:[%s813_s3 + $0x10] sm:$0xf] %vm400_vm3, %v480_v39  ;;  %v481_v45 = vpack.c.bf16 %v269_v40, %v269_v40  ;;  %v530_v47 = vpop.f32.mrb[8].mxu0 }
  0xed   :  { %421 = vst.msk [vmem:[%s813_s3 + $0x50] sm:$0xf] %vm400_vm3, %v496_v41  ;;  %v497_v48 = vpack.c.bf16 %v285_v42, %v285_v42  ;;  %v546_v49 = vpop.f32.mrb[8].mxu1  ;;  %408 = vst.msk [vmem:[%s813_s3 + $0x1c] sm:$0xf] %vm400_vm3, %v483_v43  ;;  %v195_v50 = vadd.f32 %v530_v47, %v674_v46  ;;  %v186_v51 = vpop.f32.mrb[9].mxu0 }
  0xee   :  { %424 = vst.msk [vmem:[%s813_s3 + $0x5c] sm:$0xf] %vm400_vm3, %v499_v44  ;;  %v259_v52 = vadd.f32 %v546_v49, %v674_v46  ;;  %v250_v53 = vpop.f32.mrb[9].mxu1  ;;  %406 = vst.msk [vmem:[%s813_s3 + $0x14] sm:$0xf] %vm400_vm3, %v481_v45  ;;  %v187_v54 = vadd.f32 %v674_v46, %v186_v51  ;;  %v531_v55 = vpop.f32.mrb[10].mxu0 }
  0xef   :  { %422 = vst.msk [vmem:[%s813_s3 + $0x54] sm:$0xf] %vm400_vm3, %v497_v48  ;;  %v251_v56 = vadd.f32 %v674_v46, %v250_v53  ;;  %v547_v57 = vpop.f32.mrb[10].mxu1  ;;  %v274_v58 = vmax.f32 %v195_v50, 0.0  ;;  %v198_v59 = vadd.f32 %v531_v55, %v674_v46  ;;  %v189_v60 = vpop.f32.mrb[11].mxu0 }
  0xf0   :  { %v290_v61 = vmax.f32 %v259_v52, 0.0  ;;  %v253_v62 = vpop.f32.mrb[11].mxu1  ;;  %v272_v63 = vmax.f32 %v187_v54, 0.0  ;;  %v190_v0 = vadd.f32 %v674_v46, %v189_v60 }
  0xf1   :  { %v288_v1 = vmax.f32 %v251_v56, 0.0  ;;  %v254_v2 = vadd.f32 %v674_v46, %v253_v62  ;;  %v486_v3 = vpack.c.bf16 %v274_v58, %v274_v58  ;;  %v275_v4 = vmax.f32 %v198_v59, 0.0 }
  0xf2   :  { %v502_v5 = vpack.c.bf16 %v290_v61, %v290_v61  ;;  %v484_v6 = vpack.c.bf16 %v272_v63, %v272_v63  ;;  %v273_v7 = vmax.f32 %v190_v0, 0.0 }
  0xf3   :  { %v500_v8 = vpack.c.bf16 %v288_v1, %v288_v1  ;;  %v289_v9 = vmax.f32 %v254_v2, 0.0  ;;  %411 = vst.msk [vmem:[%s813_s3 + $0x28] sm:$0xf] %vm400_vm3, %v486_v3  ;;  %v487_v10 = vpack.c.bf16 %v275_v4, %v275_v4 }
  0xf4   :  { %428 = vst.msk [vmem:[%s813_s3 + $0x68] sm:$0x1] %vm427_vm4, %v502_v5  ;;  %v485_v11 = vpack.c.bf16 %v273_v7, %v273_v7  ;;  %v534_v12 = vpop.f32.mrb[12].mxu0 }
  0xf5   :  { %409 = vst.msk [vmem:[%s813_s3 + $0x20] sm:$0xf] %vm400_vm3, %v484_v6  ;;  %425 = vst.msk [vmem:[%s813_s3 + $0x60] sm:$0xf] %vm400_vm3, %v500_v8  ;;  %v501_v13 = vpack.c.bf16 %v289_v9, %v289_v9  ;;  %v211_v14 = vadd.f32 %v534_v12, %v674_v46  ;;  %v202_v15 = vpop.f32.mrb[13].mxu0 }
  0xf6   :  { %412 = vst.msk [vmem:[%s813_s3 + $0x2c] sm:$0xf] %vm400_vm3, %v487_v10  ;;  %410 = vst.msk [vmem:[%s813_s3 + $0x24] sm:$0xf] %vm400_vm3, %v485_v11  ;;  %v203_v16 = vadd.f32 %v674_v46, %v202_v15  ;;  %v535_v17 = vpop.f32.mrb[14].mxu0 }
  0xf7   :  { %426 = vst.msk [vmem:[%s813_s3 + $0x64] sm:$0xf] %vm400_vm3, %v501_v13  ;;  %v278_v18 = vmax.f32 %v211_v14, 0.0  ;;  %v214_v19 = vadd.f32 %v535_v17, %v674_v46  ;;  %v205_v20 = vpop.f32.mrb[15].mxu0 }
  0xf8   :  { %v276_v21 = vmax.f32 %v203_v16, 0.0  ;;  %v206_v22 = vadd.f32 %v674_v46, %v205_v20 }
  0xf9   :  { %v490_v23 = vpack.c.bf16 %v278_v18, %v278_v18  ;;  %v279_v24 = vmax.f32 %v214_v19, 0.0 }
  0xfa   :  { %v488_v25 = vpack.c.bf16 %v276_v21, %v276_v21  ;;  %v277_v26 = vmax.f32 %v206_v22, 0.0 }
  0xfb   :  { %415 = vst.msk [vmem:[%s813_s3 + $0x38] sm:$0xf] %vm400_vm3, %v490_v23  ;;  %v491_v27 = vpack.c.bf16 %v279_v24, %v279_v24 }
  0xfc   :  { %413 = vst.msk [vmem:[%s813_s3 + $0x30] sm:$0xf] %vm400_vm3, %v488_v25  ;;  %v489_v28 = vpack.c.bf16 %v277_v26, %v277_v26 }
  0xfd   :  { %416 = vst.msk [vmem:[%s813_s3 + $0x3c] sm:$0xf] %vm400_vm3, %v491_v27 }
  0xfe   :  { %414 = vst.msk [vmem:[%s813_s3 + $0x34] sm:$0xf] %vm400_vm3, %v489_v28 }

// kernel: transformer_encoder_forward.11
= control target key start
LH: loop header
LB: loop body
LE: loop exit
PB: predicated region body
PF: predicated region fallthrough
CT: control target
= control target key end

     0   :  { %v519_v1 = vmov 0.0   ;;  %vm520_vm0 = vmmov 0   ;;  %vm223_vm1 = vcmask 261120   ;;  %vm377_vm2 = vcmask 257024   ;;  %s654_s1 = inlined_call_operand.vmem [shape: bf16[288,32], index: 1, kind: input, shape index: {}]   ;;  %s655_s0 = inlined_call_operand.vmem [shape: bf16[42,288], index: 0, kind: input, shape index: {}]   ;;  %s656_s2 = inlined_call_operand.vmem [shape: f32[1,32], index: 2, kind: input, shape index: {}]   ;;  %s657_s3 = inlined_call_operand.vmem [shape: bf16[42,32], index: 3, kind: output, shape index: {}]  }
   0x1   :  { %v489_v0 = vld [vmem:[%s654_s1 + $0x40] sm:$0xff]   ;;  %471 = vmatprep.subr.bf16.mxu1 %v519_v1  ;;  %475 = vmatprep.mubr.msk.bf16.mxu1 %vm520_vm0, %v519_v1  ;;  %v491_v3 = vld [vmem:[%s654_s1 + $0x48] sm:$0xff]   ;;  %v493_v5 = vld [vmem:[%s654_s1 + $0x50] sm:$0xff]   ;;  %vm383_vm3 = vcmask 253952  }
   0x2   :  { %v490_v2 = vld [vmem:[%s654_s1] sm:$0xff]   ;;  %432 = vmatprep.subr.bf16.mxu0 %v489_v0  ;;  %v492_v4 = vld [vmem:[%s654_s1 + $0x8] sm:$0xff]   ;;  %v494_v6 = vld [vmem:[%s654_s1 + $0x10] sm:$0xff]  }
   0x3   :  { %433 = vmatpush3.bf16.msra.mxu0 %v490_v2  ;;  %v495_v7 = vld [vmem:[%s654_s1 + $0x58] sm:$0xff]   ;;  %v497_v9 = vld [vmem:[%s654_s1 + $0x60] sm:$0xff]   ;;  %v499_v12 = vld [vmem:[%s654_s1 + $0x68] sm:$0xff]  }
   0x4   :  { %434 = vmatprep.subr.bf16.mxu0 %v491_v3  ;;  %v496_v8 = vld [vmem:[%s654_s1 + $0x18] sm:$0xff]   ;;  %v503_v10 = vld [vmem:[%s654_s1 + $0x80] sm:$0xff]   ;;  %v500_v13 = vld [vmem:[%s654_s1 + $0x28] sm:$0xff]  }
   0x5   :  { %v498_v11 = vld [vmem:[%s654_s1 + $0x20] sm:$0xff]   ;;  %472 = vmatpush3.bf16.msra.mxu1 %v503_v10  ;;  %v501_v14 = vld [vmem:[%s654_s1 + $0x70] sm:$0xff]   ;;  %v509_v16 = vld [vmem:[%s654_s1 + $0x88] sm:$0xff]  }
   0x6   :  { %473 = vmatprep.subr.bf16.mxu1 %v519_v1  ;;  %v508_v15 = vld [vmem:[%s655_s0 + $0x4] ss:$12 sps:$4 sm:$0xff]   ;;  %v510_v17 = vld [vmem:[%s655_s0 + $0x8] ss:$12 sps:$4 sm:$0xff]   ;;  %v504_v19 = vld [vmem:[%s654_s1 + $0x78] sm:$0xff]  }
   0x7   :  { %435 = vmatpush3.bf16.msra.mxu0 %v492_v4  ;;  %265 = vmatprep.mubr.bf16.mxu0 %v508_v15  ;;  %v502_v18 = vld [vmem:[%s654_s1 + $0x30] sm:$0xff]   ;;  %v505_v20 = vld [vmem:[%s654_s1 + $0x38] sm:$0xff]   ;;  %v514_v21 = vld [vmem:[%s655_s0 + $0x20] ss:$12 sps:$4 sm:$0xff]  }
   0x8   :  { %436 = vmatprep.subr.bf16.mxu0 %v493_v5  ;;  %v506_v22 = vld [vmem:[%s655_s0] ss:$12 sps:$4 sm:$0xff]   ;;  %v511_v23 = vld [vmem:[%s655_s0 + $0x1c] ss:$12 sps:$4 sm:$0xff]   ;;  %v513_v25 = vld [vmem:[%s655_s0 + $0x18] ss:$12 sps:$4 sm:$0xff]  }
   0x9   :  { %474 = vmatpush3.bf16.msra.mxu1 %v509_v16  ;;  %v518_v24 = vld [vmem:[%s655_s0 + $0x38] ss:$12 sps:$4 sm:$0x1f]   ;;  %v515_v26 = vld [vmem:[%s655_s0 + $0x34] ss:$12 sps:$4 sm:$0x1f]  }
   0xa   :  { %v517_v27 = vld [vmem:[%s655_s0 + $0x30] ss:$12 sps:$4 sm:$0x1f]   ;;  %v389_v37 = vld [vmem:[%s656_s2] ss:$0 sm:$0xff] }
   0xb   :  { %437 = vmatpush3.bf16.msra.mxu0 %v494_v6 }
   0xc   :  { %438 = vmatprep.subr.bf16.mxu0 %v495_v7  ;;  %476 = vmatmul.mubr.msk.bf16.vlgmr.msra.gmra.mrb[0].mxu1 %vm223_vm1, %v510_v17 }
   0xd   :  { %479 = vmatprep.mubr.msk.bf16.mxu1 %vm520_vm0, %v519_v1 }
   0xf   :  { %439 = vmatpush3.bf16.msra.mxu0 %v496_v8 }
  0x10   :  { %440 = vmatprep.subr.bf16.mxu0 %v497_v9 }
  0x13   :  { %441 = vmatpush3.bf16.msra.mxu0 %v498_v11 }
  0x14   :  { %442 = vmatprep.subr.bf16.mxu0 %v499_v12  ;;  %480 = vmatmul.mubr.msk.bf16.gmra.mrb[4].mxu1 %vm223_vm1, %v514_v21 }
  0x15   :  { %483 = vmatprep.mubr.msk.bf16.mxu1 %vm520_vm0, %v519_v1 }
  0x17   :  { %443 = vmatpush3.bf16.msra.mxu0 %v500_v13 }
  0x18   :  { %444 = vmatprep.subr.bf16.mxu0 %v501_v14 }
  0x1b   :  { %445 = vmatpush3.bf16.msra.mxu0 %v502_v18 }
  0x1c   :  { %446 = vmatprep.subr.bf16.mxu0 %v504_v19  ;;  %484 = vmatmul.mubr.msk.bf16.gmra.mrb[8].mxu1 %vm223_vm1, %v518_v24 }
  0x1f   :  { %447 = vmatpush3.bf16.msra.mxu0 %v505_v20 }
  0x22   :  { %266 = vmatmul.mubr.bf16.vlgmr.msra.gmra.mrb[0].mxu0 %v506_v22 }
  0x23   :  { %273 = vmatprep.mubr.bf16.mxu0 %v511_v23 }
  0x2a   :  { %274 = vmatmul.mubr.bf16.gmra.mrb[4].mxu0 %v513_v25 }
  0x2b   :  { %281 = vmatprep.mubr.bf16.mxu0 %v515_v26 }
  0x32   :  { %282 = vmatmul.mubr.bf16.gmra.mrb[8].mxu0 %v517_v27 }
  0xdf   :  { %v324_v28 = vpop.f32.mrb[0].mxu1 }
  0xe0   :  { %v477_v29 = vpop.f32.mrb[1].mxu1 }
  0xe1   :  { %v327_v30 = vpop.f32.mrb[2].mxu1 }
  0xe2   :  { %v478_v31 = vpop.f32.mrb[3].mxu1 }
  0xe7   :  { %v332_v32 = vpop.f32.mrb[4].mxu1 }
  0xe8   :  { %v481_v33 = vpop.f32.mrb[5].mxu1 }
  0xe9   :  { %v335_v35 = vpop.f32.mrb[6].mxu1 }
  0xea   :  { %v482_v38 = vpop.f32.mrb[7].mxu1 }
  0xef   :  { %v340_v46 = vpop.f32.mrb[8].mxu1 }
  0xf0   :  { %v485_v47 = vpop.f32.mrb[9].mxu1 }
  0xf1   :  { %v343_v51 = vpop.f32.mrb[10].mxu1 }
  0xf2   :  { %v486_v53 = vpop.f32.mrb[11].mxu1 }
  0xf5   :  { %v448_v34 = vpop.f32.mrb[0].mxu0 }
  0xf6   :  { %v449_v36 = vpop.f32.mrb[1].mxu0 }
  0xf7   :  { %v450_v39 = vadd.f32 %v449_v36, %v448_v34  ;;  %v451_v40 = vpop.f32.mrb[2].mxu0 }
  0xf8   :  { %v452_v41 = vpop.f32.mrb[3].mxu0 }
  0xf9   :  { %v268_v42 = vadd.f32 %v450_v39, %v389_v37  ;;  %v453_v43 = vadd.f32 %v452_v41, %v451_v40 }
  0xfb   :  { %v325_v44 = vadd.f32 %v324_v28, %v268_v42  ;;  %v271_v45 = vadd.f32 %v453_v43, %v389_v37 }
  0xfd   :  { %v347_v48 = vmax.f32 %v325_v44, 0.0  ;;  %v328_v49 = vadd.f32 %v327_v30, %v271_v45  ;;  %v454_v50 = vpop.f32.mrb[4].mxu0 }
  0xfe   :  { %v455_v52 = vpop.f32.mrb[5].mxu0 }
  0xff   :  { %v426_v54 = vpack.c.bf16 %v347_v48, %v347_v48  ;;  %v348_v55 = vmax.f32 %v328_v49, 0.0  ;;  %v456_v56 = vadd.f32 %v455_v52, %v454_v50  ;;  %v457_v57 = vpop.f32.mrb[6].mxu0 }
 0x100   :  { %v458_v58 = vpop.f32.mrb[7].mxu0 }
 0x101   :  { %378 = vst.msk [vmem:[%s657_s3] sm:$0xf] %vm377_vm2, %v426_v54  ;;  %v427_v59 = vpack.c.bf16 %v348_v55, %v348_v55  ;;  %v276_v60 = vadd.f32 %v456_v56, %v389_v37  ;;  %v459_v61 = vadd.f32 %v458_v58, %v457_v57 }
 0x103   :  { %379 = vst.msk [vmem:[%s657_s3 + $0x4] sm:$0xf] %vm377_vm2, %v427_v59  ;;  %v333_v62 = vadd.f32 %v332_v32, %v276_v60  ;;  %v279_v63 = vadd.f32 %v459_v61, %v389_v37 }
 0x105   :  { %v349_v0 = vmax.f32 %v333_v62, 0.0  ;;  %v336_v1 = vadd.f32 %v335_v35, %v279_v63  ;;  %v460_v2 = vpop.f32.mrb[8].mxu0 }
 0x106   :  { %v461_v3 = vpop.f32.mrb[9].mxu0 }
 0x107   :  { %v428_v4 = vpack.c.bf16 %v349_v0, %v349_v0  ;;  %v350_v5 = vmax.f32 %v336_v1, 0.0  ;;  %v462_v6 = vadd.f32 %v461_v3, %v460_v2  ;;  %v463_v7 = vpop.f32.mrb[10].mxu0 }
 0x108   :  { %v464_v8 = vpop.f32.mrb[11].mxu0 }
 0x109   :  { %380 = vst.msk [vmem:[%s657_s3 + $0x8] sm:$0xf] %vm377_vm2, %v428_v4  ;;  %v429_v9 = vpack.c.bf16 %v350_v5, %v350_v5  ;;  %v284_v10 = vadd.f32 %v462_v6, %v389_v37  ;;  %v465_v11 = vadd.f32 %v464_v8, %v463_v7 }
 0x10b   :  { %381 = vst.msk [vmem:[%s657_s3 + $0xc] sm:$0xf] %vm377_vm2, %v429_v9  ;;  %v341_v12 = vadd.f32 %v340_v46, %v284_v10  ;;  %v287_v13 = vadd.f32 %v465_v11, %v389_v37 }
 0x10d   :  { %v351_v14 = vmax.f32 %v341_v12, 0.0  ;;  %v344_v15 = vadd.f32 %v343_v51, %v287_v13 }
 0x10f   :  { %v430_v16 = vpack.c.bf16 %v351_v14, %v351_v14  ;;  %v352_v17 = vmax.f32 %v344_v15, 0.0 }
 0x111   :  { %382 = vst.msk [vmem:[%s657_s3 + $0x10] sm:$0xf] %vm377_vm2, %v430_v16  ;;  %v431_v18 = vpack.c.bf16 %v352_v17, %v352_v17 }
 0x113   :  { %384 = vst.msk [vmem:[%s657_s3 + $0x14] sm:$0x1] %vm383_vm3, %v431_v18 }

// kernel: transformer_encoder_forward.12
= control target key start
LH: loop header
LB: loop body
LE: loop exit
PB: predicated region body
PF: predicated region fallthrough
CT: control target
= control target key end

     0   :  { %s520_s18 = smov 0   ;;  %s568_s0 = inlined_call_operand.vmem [shape: bf16[2,7,96], index: 0, kind: input, shape index: {}]   ;;  %s569_s1 = inlined_call_operand.vmem [shape: f32[2,7,1], index: 1, kind: input, shape index: {}]   ;;  %s570_s2 = inlined_call_operand.vmem [shape: f32[7,32], index: 2, kind: input, shape index: {}]   ;;  %s571_s3 = inlined_call_operand.vmem [shape: bf16[96,32], index: 3, kind: input, shape index: {}]   ;;  %s572_s4 = inlined_call_operand.vmem [shape: f32[1,32], index: 4, kind: input, shape index: {}]   ;;  %s573_s5 = inlined_call_operand.vmem [shape: bf16[2,7,32], index: 5, kind: output, shape index: {}]  }
   0x1 LB: > { %s420_s19 = sadd.s32 4294967295, %s485_s18   ;;  %p424_p0 = scmp.ge.s32.totalorder %s485_s18, 1  ;;  %s485_s18 = sphi %s520_s18, %s15_s18  }
   0x2   : > { %p195_p1 = scmp.lt.s32.totalorder %s485_s18, 3 }
   0x4   : > { %p196_p2 = pnand %p424_p0, %p195_p1 }
   0x5   : > { %v473_v0 = vld [vmem:[%s571_s3] sm:$0xff] (!%p196_p2)   ;;  %v487_v1 = vmov (!%p196_p2), 0.0   ;;  %v474_v2 = vld [vmem:[%s571_s3 + $0x8] sm:$0xff] (!%p196_p2)   ;;  %vm488_vm0 = vmmov (!%p196_p2), 0   ;;  %p225_p3 = scmp.lt.s32.totalorder (!%p196_p2), %s420_s19, 1  ;;  %v475_v3 = vld [vmem:[%s571_s3 + $0x10] sm:$0xff] (!%p196_p2)  }
   0x6   : > { %199 = sbr.rel (%p196_p2) target bundleno = 254 (0xfe), region = 40  ;;  %445 = vmatprep.subr.bf16.mxu0 (!%p196_p2), %v487_v1  ;;  %457 = vmatprep.mubr.msk.bf16.mxu0 (!%p196_p2), %vm488_vm0, %v487_v1  ;;  %v489_v4 = vmov (!%p196_p2), 0   ;;  %v476_v6 = vld [vmem:[%s571_s3 + $0x18] sm:$0xff] (!%p196_p2)   ;;  %v477_v7 = vld [vmem:[%s571_s3 + $0x20] sm:$0xff] (!%p196_p2)   ;;  %v478_v8 = vld [vmem:[%s571_s3 + $0x28] sm:$0xff] (!%p196_p2)   ;;  %vm294_vm1 = vcmask (!%p196_p2), 785408  }
   0x7   : > { %446 = vmatpush3.bf16.msra.mxu0 (!%p196_p2), %v473_v0  ;;  %472 = vset.pattern.permute.xlu0 (!%p196_p2), %v489_v4  ;;  %v428_v10 = vld [vmem:[%s572_s4] ss:$0 sm:$0xff] (!%p196_p2)  ;;  %vm349_vm2 = vcmask (!%p196_p2), 257024   ;;  %vm350_vm3 = vsmask.f32 (!%p196_p2), 3328 }
   0x8   : > { %447 = vmatprep.subr.bf16.mxu0 (!%p196_p2), %v487_v1  ;;  %v339_v15 = vld [vmem:[%s570_s2] sm:$0x7f] (!%p196_p2)  ;;  %vm351_vm4 = vmand (!%p196_p2), %vm349_vm2, %vm350_vm3 }
   0xb   : > { %448 = vmatpush3.bf16.msra.mxu0 (!%p196_p2), %v474_v2 }
   0xc   : > { %449 = vmatprep.subr.bf16.mxu0 (!%p196_p2), %v487_v1 }
   0xd   : > { %s575_s19 = smov (!%p225_p3, %s420_s19), 1 }
   0xe   : > { %s426_s26 = sshll.u32 %s575_s19, 3  ;;  %s425_s9 = sshll.u32 %s575_s19, 2 }
   0xf   : > { %s232_s29 = scalar_lea.vmem %s569_s1, %s426_s26  ;;  %450 = vmatpush3.bf16.msra.mxu0 %v475_v3  ;;  %s228_s14 = scalar_lea.vmem %s568_s0, %s425_s9 }
  0x10   : > { %v341_v5 = vld [vmem:[%s232_s29] sm:$0x7f]  ;;  %451 = vmatprep.subr.bf16.mxu0 %v487_v1  ;;  %s236_s22 = scalar_lea.vmem %s573_s5, %s425_s9 }
  0x11   : > { %344 = vperm.xlu0 %472, %v341_v5   ;;  %v238_v9 = vld [vmem:[%s228_s14] sm:$0xf] }
  0x12   : > { %v352_v21 = vld [vmem:[%s236_s22] sm:$0xf] }
  0x13   : > { %452 = vmatpush3.bf16.msra.mxu0 %v476_v6 }
  0x14   : > { %453 = vmatprep.subr.bf16.mxu0 %v487_v1 }
  0x17   : > { %454 = vmatpush3.bf16.msra.mxu0 %v477_v7 }
  0x18   : > { %455 = vmatprep.subr.bf16.mxu0 %v487_v1 }
  0x1b   : > { %456 = vmatpush3.bf16.msra.mxu0 %v478_v8 }
  0x1e   : > { %458 = vmatmul.mubr.msk.bf16.vlgmr.msra.gmra.mrb[0].mxu0 %vm294_vm1, %v238_v9 }
  0x90   : > { %v345_v18 = vpop.permute.xlu0 %344 }
  0xf1   : > { %v332_v11 = vpop.f32.mrb[0].mxu0 }
  0xf2   : > { %v333_v12 = vadd.f32 %v428_v10, %v332_v11  ;;  %v459_v13 = vpop.f32.mrb[1].mxu0 }
  0xf3   : > { %v335_v14 = vpop.f32.mrb[2].mxu0 }
  0xf4   : > { %v338_v16 = vmul.f32 5.656854, %v333_v12  ;;  %v460_v17 = vpop.f32.mrb[3].mxu0 }
  0xf6   : > { %v340_v19 = vadd.f32 %v339_v15, %v338_v16 }
  0xf8   : > { %v347_v20 = vmul.f32 %v345_v18, %v340_v19 }
  0xfa   : > { %v348_v22 = vpack.c.bf16 %v347_v20, %v347_v20 }
  0xfc   : > { %v353_v23 = vsel %vm351_vm4, %v348_v22, %v352_v21 }
  0xfd   : > { %354 = vst [vmem:[%s236_s22] sm:$0xf] %v353_v23 }
  0xfe PF: > { %s15_s18 = sadd.s32 1, %s485_s18  }
  0xff   : > { %p12_p4 = scmp.ge.s32.totalorder %s15_s18, 4  }
 0x101   :  { %14 = sbr.rel (!%p12_p4) target bundleno = 1 (0x1), region = 73 }

// kernel: transformer_encoder_forward.13
= control target key start
LH: loop header
LB: loop body
LE: loop exit
PB: predicated region body
PF: predicated region fallthrough
CT: control target
= control target key end

     0   :  { %s749_s24 = smov 0   ;;  %s854_s0 = inlined_call_operand.vmem [shape: bf16[2,7,32], index: 0, kind: input, shape index: {}]   ;;  %s855_s1 = inlined_call_operand.vmem [shape: f32[1,32], index: 1, kind: input, shape index: {}]   ;;  %s856_s2 = inlined_call_operand.vmem [shape: f32[1,32], index: 2, kind: input, shape index: {}]   ;;  %s857_s3 = inlined_call_operand.vmem [shape: bf16[32,96], index: 3, kind: input, shape index: {}]   ;;  %s858_s4 = inlined_call_operand.vmem [shape: f32[1,96], index: 4, kind: input, shape index: {}]   ;;  %s859_s5 = inlined_call_operand.vmem [shape: bf16[2,4,7,8], index: 5, kind: output, shape index: {0}]   ;;  %s860_s6 = inlined_call_operand.vmem [shape: bf16[2,4,7,8], index: 6, kind: output, shape index: {1}]   ;;  %s861_s7 = inlined_call_operand.vmem [shape: bf16[2,4,7,8], index: 7, kind: output, shape index: {2}]  }
   0x1 LB: > { %s609_s25 = sadd.s32 4294967295, %s694_s24   ;;  %p613_p0 = scmp.ge.s32.totalorder %s694_s24, 1  ;;  %s694_s24 = sphi %s749_s24, %s18_s24  }
   0x2   : > { %p241_p1 = scmp.lt.s32.totalorder %s694_s24, 3 }
   0x4   : > { %p242_p2 = pnand %p613_p0, %p241_p1 }
   0x5   : > { %p282_p3 = scmp.lt.s32.totalorder (!%p242_p2), %s609_s25, 1  ;;  %vm304_vm0 = vcmask (!%p242_p2), 260096   ;;  %v684_v8 = vld [vmem:[%s857_s3] sm:$0xff] (!%p242_p2)   ;;  %v696_v9 = vmov (!%p242_p2), 0.0   ;;  %vm697_vm1 = vmmov (!%p242_p2), 0   ;;  %v685_v10 = vld [vmem:[%s857_s3 + $0x8] sm:$0xff] (!%p242_p2)  }
   0x6   : > { %245 = sbr.rel (%p242_p2) target bundleno = 699 (0x2bb), region = 40  ;;  %655 = vmatprep.subr.bf16.mxu0 (!%p242_p2), %v696_v9  ;;  %659 = vmatprep.mubr.msk.bf16.mxu0 (!%p242_p2), %vm697_vm1, %v696_v9  ;;  %v621_v15 = vld [vmem:[%s855_s1] ss:$0 sm:$0xff] (!%p242_p2)  ;;  %vm359_vm2 = vcmask (!%p242_p2), 261120   ;;  %vm404_vm3 = vcmask (!%p242_p2), 60416   ;;  %s698_s21 = smov (!%p242_p2), 120  }
   0x7   : > { %656 = vmatpush3.bf16.msra.mxu0 (!%p242_p2), %v684_v8  ;;  %v622_v17 = vld [vmem:[%s856_s2] ss:$0 sm:$0xff] (!%p242_p2)  ;;  %vm405_vm4 = vsmask.f32 (!%p242_p2), 3328  ;;  %s699_s22 = smov (!%p242_p2), 96   ;;  %s700_s23 = smov (!%p242_p2), 72  }
   0x8   : > { %657 = vmatprep.subr.bf16.mxu0 (!%p242_p2), %v696_v9  ;;  %v623_v21 = vld [vmem:[%s858_s4] ss:$0 sm:$0xff] (!%p242_p2)  ;;  %vm788_vm5 = vmand (!%p242_p2), %vm404_vm3, %vm405_vm4  ;;  %s703_s27 = smov (!%p242_p2), 56   ;;  %s704_s28 = smov (!%p242_p2), 112  }
   0x9   : > { %s706_s30 = smov (!%p242_p2), 48   ;;  %s707_s8 = smov (!%p242_p2), 104  }
   0xa   : > { %s708_s9 = smov (!%p242_p2), 40  }
   0xb   : > { %658 = vmatpush3.bf16.msra.mxu0 (!%p242_p2), %v685_v10 }
   0xd   : > { %s865_s25 = smov (!%p282_p3, %s609_s25), 1 }
   0xe   : > { %s614_s26 = sshll.u32 %s865_s25, 2  ;;  %s776_s15 = sshll.u32 %s865_s25, 4 }
   0xf   : > { %s285_s29 = scalar_lea.vmem %s854_s0, %s614_s26  ;;  %s785_s20 = scalar_lea.vmem %s859_s5, %s776_s15 }
  0x10   : > { %v302_v0 = vld [vmem:[%s285_s29] sm:$0xf]  ;;  %s701_s25 = smov 64   ;;  %s702_s26 = smov 88   ;;  %v628_v31 = vld [vmem:[%s785_s20 + $0x4] sm:$0xf] }
  0x11   : > { %v303_v1 = vunpack.c.l.bf16 %v302_v0  ;;  %v407_v25 = vld [vmem:[%s785_s20] sm:$0xf]  ;;  %s705_s29 = smov 80   ;;  %s799_s12 = scalar_lea.vmem %s860_s6, %s776_s15  ;;  %v634_v49 = vld [vmem:[%s785_s20 + $0x8] sm:$0xf] }
  0x12   : > { %v416_v32 = vld [vmem:[%s799_s12] sm:$0xf]  ;;  %s807_s16 = scalar_lea.vmem %s861_s7, %s776_s15  ;;  %v642_v37 = vld [vmem:[%s799_s12 + $0xc] sm:$0xf]  ;;  %v630_v43 = vld [vmem:[%s799_s12 + $0x4] sm:$0xf] }
  0x13   : > { %v305_v2 = vsel %vm304_vm0, %v303_v1, 0.0  ;;  %v422_v38 = vld [vmem:[%s807_s16] sm:$0xf]  ;;  %v632_v46 = vld [vmem:[%s807_s16 + $0x4] sm:$0xf] }
  0x14   : > { %306 = vadd.xlane.f32.xlu0 %v305_v2  ;;  %v636_v52 = vld [vmem:[%s799_s12 + $0x8] sm:$0xf]  ;;  %v640_v58 = vld [vmem:[%s785_s20 + $0xc] sm:$0xf] }
  0x15   : > { %v638_v55 = vld [vmem:[%s807_s16 + $0x8] sm:$0xf]  ;;  %v644_v61 = vld [vmem:[%s807_s16 + $0xc] sm:$0xf] }
  0xa1   : > { %v307_v3 = vpop.xlane.xlu0 %306 }
  0xa2   : > { %v309_v4 = vmul.f32 0.03125, %v307_v3 }
  0xa4   : > { %v310_v5 = vsub.f32 %v303_v1, %v309_v4 }
  0xa6   : > { %v311_v6 = vmul.f32 %v310_v5, %v310_v5 }
  0xa8   : > { %v312_v7 = vsel %vm304_vm0, %v311_v6, 0.0 }
  0xa9   : > { %313 = vadd.xlane.f32.xlu0 %v312_v7 }
 0x136   : > { %v314_v11 = vpop.xlane.xlu0 %313 }
 0x137   : > { %v315_v12 = vmul.f32 0.03125, %v314_v11 }
 0x139   : > { %v316_v13 = vadd.f32 1e-12, %v315_v12 }
 0x13b   : > { %686 = vrsqrt.f32 %v316_v13 }
 0x145   : > { %v687_v14 = vpop.eup %686 }
 0x146   : > { %v318_v16 = vmul.f32 %v687_v14, %v310_v5 }
 0x148   : > { %v326_v18 = vmul.f32 %v621_v15, %v318_v16 }
 0x14a   : > { %v334_v19 = vadd.f32 %v622_v17, %v326_v18 }
 0x14c   : > { %v335_v20 = vpack.c.bf16 %v334_v19, %v334_v19 }
 0x14e   : > { %660 = vmatmul.mubr.msk.bf16.vlgmr.msra.gmra.mrb[0].mxu0 %vm359_vm2, %v335_v20 }
 0x221   : > { %v397_v22 = vpop.f32.mrb[0].mxu0 }
 0x222   : > { %v398_v23 = vadd.f32 %v623_v21, %v397_v22  ;;  %v661_v24 = vpop.f32.mrb[1].mxu0 }
 0x223   : > { %v400_v26 = vpop.f32.mrb[2].mxu0 }
 0x224   : > { %v403_v28 = vpack.c.bf16 %v398_v23, %v398_v23  ;;  %v662_v29 = vpop.f32.mrb[3].mxu0 }
 0x226   : > { %425 = vrot.lane.b32.xlu0 %v403_v28, %s698_s21  ;;  %413 = vrot.lane.b32.xlu1 %v403_v28, %s699_s22  ;;  %v408_v30 = vsel %vm788_vm5, %v403_v28, %v407_v25 }
 0x227   : > { %409 = vst [vmem:[%s785_s20] sm:$0xf] %v408_v30 }
 0x22a   : > { %474 = vrot.lane.b32.xlu0 %v403_v28, %s700_s23  ;;  %419 = vrot.lane.b32.xlu1 %v403_v28, %s701_s25 }
 0x22e   : > { %432 = vrot.lane.b32.xlu1 %v403_v28, %s702_s26 }
 0x232   : > { %439 = vrot.lane.b32.xlu1 %v403_v28, %s703_s27 }
 0x236   : > { %446 = vrot.lane.b32.xlu1 %v403_v28, %s704_s28 }
 0x23a   : > { %453 = vrot.lane.b32.xlu1 %v403_v28, %s705_s29 }
 0x23e   : > { %460 = vrot.lane.b32.xlu1 %v403_v28, %s706_s30 }
 0x242   : > { %467 = vrot.lane.b32.xlu1 %v403_v28, %s707_s8 }
 0x246   : > { %481 = vrot.lane.b32.xlu1 %v403_v28, %s708_s9 }
 0x298   : > { %v426_v33 = vpop.permute.xlu0 %425  ;;  %v414_v34 = vpop.permute.xlu1 %413 }
 0x299   : > { %v430_v35 = vsel %vm788_vm5, %v426_v33, %v628_v31  ;;  %v417_v36 = vsel %vm788_vm5, %v414_v34, %v416_v32 }
 0x29a   : > { %629 = vst [vmem:[%s785_s20 + $0x4] sm:$0xf] %v430_v35  ;;  %418 = vst [vmem:[%s799_s12] sm:$0xf] %v417_v36 }
 0x29c   : > { %v475_v39 = vpop.permute.xlu0 %474  ;;  %v420_v40 = vpop.permute.xlu1 %419 }
 0x29d   : > { %v479_v41 = vsel %vm788_vm5, %v475_v39, %v642_v37  ;;  %v423_v42 = vsel %vm788_vm5, %v420_v40, %v422_v38 }
 0x29e   : > { %643 = vst [vmem:[%s799_s12 + $0xc] sm:$0xf] %v479_v41  ;;  %424 = vst [vmem:[%s807_s16] sm:$0xf] %v423_v42 }
 0x2a0   : > { %v433_v44 = vpop.permute.xlu1 %432 }
 0x2a1   : > { %v437_v45 = vsel %vm788_vm5, %v433_v44, %v630_v43 }
 0x2a2   : > { %631 = vst [vmem:[%s799_s12 + $0x4] sm:$0xf] %v437_v45 }
 0x2a4   : > { %v440_v47 = vpop.permute.xlu1 %439 }
 0x2a5   : > { %v444_v48 = vsel %vm788_vm5, %v440_v47, %v632_v46 }
 0x2a6   : > { %633 = vst [vmem:[%s807_s16 + $0x4] sm:$0xf] %v444_v48 }
 0x2a8   : > { %v447_v50 = vpop.permute.xlu1 %446 }
 0x2a9   : > { %v451_v51 = vsel %vm788_vm5, %v447_v50, %v634_v49 }
 0x2aa   : > { %635 = vst [vmem:[%s785_s20 + $0x8] sm:$0xf] %v451_v51 }
 0x2ac   : > { %v454_v53 = vpop.permute.xlu1 %453 }
 0x2ad   : > { %v458_v54 = vsel %vm788_vm5, %v454_v53, %v636_v52 }
 0x2ae   : > { %637 = vst [vmem:[%s799_s12 + $0x8] sm:$0xf] %v458_v54 }
 0x2b0   : > { %v461_v56 = vpop.permute.xlu1 %460 }
 0x2b1   : > { %v465_v57 = vsel %vm788_vm5, %v461_v56, %v638_v55 }
 0x2b2   : > { %639 = vst [vmem:[%s807_s16 + $0x8] sm:$0xf] %v465_v57 }
 0x2b4   : > { %v468_v59 = vpop.permute.xlu1 %467 }
 0x2b5   : > { %v472_v60 = vsel %vm788_vm5, %v468_v59, %v640_v58 }
 0x2b6   : > { %641 = vst [vmem:[%s785_s20 + $0xc] sm:$0xf] %v472_v60 }
 0x2b8   : > { %v482_v62 = vpop.permute.xlu1 %481 }
 0x2b9   : > { %v486_v63 = vsel %vm788_vm5, %v482_v62, %v644_v61 }
 0x2ba   : > { %645 = vst [vmem:[%s807_s16 + $0xc] sm:$0xf] %v486_v63 }
 0x2bb PF: > { %s18_s24 = sadd.s32 1, %s694_s24  }
 0x2bc   : > { %p15_p4 = scmp.ge.s32.totalorder %s18_s24, 4  }
 0x2be   :  { %17 = sbr.rel (!%p15_p4) target bundleno = 1 (0x1), region = 103 }

// kernel: transformer_encoder_forward.14
= control target key start
LH: loop header
LB: loop body
LE: loop exit
PB: predicated region body
PF: predicated region fallthrough
CT: control target
= control target key end

     0   :  { %s759_s15 = smov 0   ;;  %s761_s16 = smov 0   ;;  %s833_s0 = inlined_call_operand.vmem [shape: bf16[2,4,7,8], index: 0, kind: input, shape index: {}]   ;;  %s834_s1 = inlined_call_operand.vmem [shape: bf16[2,4,7,8], index: 1, kind: input, shape index: {}]   ;;  %s835_s2 = inlined_call_operand.vmem [shape: bf16[2,4,7,8], index: 2, kind: input, shape index: {}]   ;;  %s836_s3 = inlined_call_operand.vmem [shape: f32[2,1,7], index: 3, kind: input, shape index: {}]   ;;  %s837_s4 = inlined_call_operand.vmem [shape: bf16[4,2,7,8], index: 4, kind: output, shape index: {}]  }
   0x1   :  { %s763_s17 = smov 0   ;;  %s765_s18 = smov 0  }
   0x2   :  { %s767_s19 = smov 0  }
   0x3 LB: > { %s29_s20 = sadd.s32 1, %s720_s17  ;;  %s33_s21 = sadd.s32 1, %s724_s18  ;;  %s728_s19 = sphi %s767_s19, %s14_s19   ;;  %s724_s18 = sphi %s765_s18, %s841_s18   ;;  %s720_s17 = sphi %s763_s17, %s840_s17   ;;  %s716_s16 = sphi %s761_s16, %s839_s16   ;;  %s712_s15 = sphi %s759_s15, %s838_s15  }
   0x4   : > { %p31_p0 = scmp.ge.s32.totalorder %s29_s20, 4  ;;  %p613_p1 = scmp.ge.s32.totalorder %s728_s19, 1 }
   0x5   : > { %p233_p2 = scmp.lt.s32.totalorder %s728_s19, 9 }
   0x6   : > { %s843_s20 = smov (%p31_p0, %s29_s20), 0  ;;  %s845_s21 = smov (!%p31_p0, %s33_s21), %s724_s18 }
   0x7   : > { %p234_p3 = pnand %p613_p1, %p233_p2  ;;  %p35_p4 = scmp.ge.s32.totalorder %s845_s21, 2 }
   0x8   : > { %p290_p5 = scmp.lt.s32.totalorder (!%p234_p3), %s716_s16, 1  ;;  %p292_p6 = scmp.lt.s32.totalorder (!%p234_p3), %s712_s15, 3  ;;  %v730_v0 = vmov (!%p234_p3), 0.0   ;;  %vm731_vm0 = vmmov (!%p234_p3), 0   ;;  %vm334_vm1 = vcmask (!%p234_p3), 64512   ;;  %v384_v4 = vlaneseq (!%p234_p3) }
   0x9   : > { %s847_s21 = smov (%p35_p4, %s845_s21), 0  ;;  %237 = sbr.rel (%p234_p3) target bundleno = 775 (0x307), region = 36 }
   0xa   : > { %630 = vmatprep.subr.bf16.mxu0 (!%p234_p3), %v730_v0  ;;  %632 = vmatprep.mubr.msk.bf16.mxu0 (!%p234_p3), %vm731_vm0, %v730_v0  ;;  %v385_v6 = vshrl.u32 (!%p234_p3), %v384_v4, 7  ;;  %v732_v8 = vmov (!%p234_p3), 0   ;;  %vm390_vm4 = vcmask (!%p234_p3), 55296   ;;  %vm408_vm5 = vcmask (!%p234_p3), 1042432  }
   0xb   : > { %636 = vmatprep.subr.bf16.mxu1 (!%p234_p3), %v730_v0  ;;  %638 = vmatprep.mubr.msk.bf16.mxu1 (!%p234_p3), %vm731_vm0, %v730_v0  ;;  %vm409_vm6 = vcmask (!%p234_p3), 1043456   ;;  %v733_v23 = vmov (!%p234_p3), 65535   ;;  %vm404_vm7 = vcmask (!%p234_p3), 56320   ;;  %vm456_vm8 = vcmask (!%p234_p3), 60416  }
   0xc   : > { %v386_v7 = vsub.s32 (!%p234_p3), 0, %v385_v6  ;;  %v410_v24 = vsel (!%p234_p3), %vm408_vm5, 4294967295, %v733_v23  ;;  %vm457_vm9 = vsmask.f32 (!%p234_p3), 3328 }
   0xd   : > { %v411_v25 = vsel (!%p234_p3), %vm409_vm6, %v410_v24, 0  ;;  %vm458_vm10 = vmand (!%p234_p3), %vm456_vm8, %vm457_vm9 }
  0x10   : > { %s849_s16 = smov (!%p290_p5, %s716_s16), 1  ;;  %s851_s15 = smov (!%p292_p6, %s712_s15), 3 }
  0x11   : > { %s614_s22 = sshll.u32 %s849_s16, 2  ;;  %s319_s7 = scalar_lea.vmem %s836_s3, %s849_s16 }
  0x12   : > { %s298_s23 = sadd.s32 %s614_s22, %s851_s15  ;;  %v381_v5 = vld [vmem:[%s319_s7] sm:$0x1]  ;;  %s620_s11 = sshll.u32 %s851_s15, 1 }
  0x13   : > { %s795_s24 = sshll.u32 %s298_s23, 2  ;;  %vm382_vm2 = vcmp.gt.f32.partialorder %v381_v5, 0.5  ;;  %s328_s12 = sadd.s32 %s620_s11, %s849_s16 }
  0x14   : > { %s308_s27 = scalar_lea.vmem %s834_s1, %s795_s24  ;;  %s300_s30 = scalar_lea.vmem %s833_s0, %s795_s24  ;;  %v383_v9 = vsel %vm382_vm2, 1, %v732_v8 }
  0x15   : > { %v333_v1 = vld [vmem:[%s308_s27] sm:$0xf]  ;;  %v387_v10 = vrot.slane %v383_v9, %v386_v7  ;;  %s316_s10 = scalar_lea.vmem %s835_s2, %s795_s24  ;;  %s621_s13 = sshll.u32 %s328_s12, 2 }
  0x16   : > { %v339_v2 = vsel %vm334_vm1, %v333_v1, 0  ;;  %v332_v3 = vld [vmem:[%s300_s30] sm:$0xf]  ;;  %s330_s23 = scalar_lea.vmem %s837_s4, %s621_s13 }
  0x17   : > { %631 = vmatpush3.bf16.xpose.msra.mxu0 %v339_v2  ;;  %vm388_vm3 = vcmp.eq.s32.totalorder %v387_v10, 1  ;;  %v403_v22 = vld [vmem:[%s316_s10] sm:$0xf] }
  0x18   : > { %v413_v26 = vand.u32 %v411_v25, %v403_v22  ;;  %v459_v32 = vld [vmem:[%s330_s23] sm:$0xf] }
  0x1a   : > { %637 = vmatpush3.bf16.msra.mxu1 %v413_v26 }
  0x1e   : > { %633 = vmatmul.mubr.msk.bf16.vlgmr.msra.gmra.mrb[0].mxu0 %vm334_vm1, %v332_v3 }
  0xf1   : > { %v375_v11 = vpop.f32.mrb[0].mxu0 }
  0xf2   : > { %v389_v12 = vsel %vm388_vm3, %v375_v11, -3.4028235e+38  ;;  %v634_v13 = vpop.f32.mrb[1].mxu0 }
  0xf3   : > { %v378_v14 = vpop.f32.mrb[2].mxu0  ;;  %v391_v15 = vsel %vm390_vm4, %v389_v12, -inf }
  0xf4   : > { %392 = vmax.xlane.f32.xlu0 %v391_v15  ;;  %v635_v16 = vpop.f32.mrb[3].mxu0 }
 0x181   : > { %v393_v17 = vpop.xlane.xlu0 %392 }
 0x182   : > { %v394_v18 = vsub.f32 %v389_v12, %v393_v17 }
 0x184   : > { %v395_v19 = vmul.f32 1.442695, %v394_v18 }
 0x186   : > { %686 = vpow2.f32 %v395_v19 }
 0x190   : > { %v687_v20 = vpop.eup %686 }
 0x191   : > { %v397_v21 = vsel %vm390_vm4, %v687_v20, 0.0 }
 0x192   : > { %398 = vadd.xlane.f32.xlu0 %v397_v21 }
 0x21f   : > { %v399_v27 = vpop.xlane.xlu0 %398 }
 0x220   : > { %688 = vrcp.f32 %v399_v27 }
 0x22a   : > { %v689_v28 = vpop.eup %688 }
 0x22b   : > { %v401_v29 = vmul.f32 %v689_v28, %v687_v20 }
 0x22d   : > { %v402_v30 = vpack.c.bf16 %v401_v29, %v401_v29 }
 0x22f   : > { %639 = vmatmul.mubr.msk.bf16.vlgmr.msra.gmra.mrb[0].mxu1 %vm404_vm7, %v402_v30 }
 0x302   : > { %v449_v31 = vpop.f32.mrb[0].mxu1 }
 0x303   : > { %v455_v33 = vpack.c.bf16 %v449_v31, %v449_v31  ;;  %v640_v34 = vpop.f32.mrb[1].mxu1 }
 0x304   : > { %v452_v35 = vpop.f32.mrb[2].mxu1 }
 0x305   : > { %v460_v36 = vsel %vm458_vm10, %v455_v33, %v459_v32  ;;  %v641_v37 = vpop.f32.mrb[3].mxu1 }
 0x306   : > { %461 = vst [vmem:[%s330_s23] sm:$0xf] %v460_v36 }
 0x307 PF: > { %s14_s19 = sadd.s32 1, %s728_s19   ;;  %s838_s15 = smov %s720_s17 }
 0x308   : > { %p11_p7 = scmp.ge.s32.totalorder %s14_s19, 10   ;;  %s839_s16 = smov %s724_s18 }
 0x309   : > { %s840_s17 = smov %s843_s20  ;;  %s841_s18 = smov %s847_s21 }
 0x30a   :  { %13 = sbr.rel (!%p11_p7) target bundleno = 3 (0x3), region = 75 }

// kernel: transformer_encoder_forward.19
= control target key start
LH: loop header
LB: loop body
LE: loop exit
PB: predicated region body
PF: predicated region fallthrough
CT: control target
= control target key end

     0   :  { %vm18_vm0 = vcmask 261120   ;;  %vm22_vm1 = vcmask 259072   ;;  %s121_s0 = inlined_call_operand.vmem [shape: bf16[14,32], index: 0, kind: input, shape index: {}]   ;;  %s122_s1 = inlined_call_operand.vmem [shape: f32[1,32], index: 1, kind: input, shape index: {}]   ;;  %s123_s2 = inlined_call_operand.vmem [shape: f32[1,32], index: 2, kind: input, shape index: {}]   ;;  %s124_s3 = inlined_call_operand.vmem [shape: f32[14,32], index: 3, kind: output, shape index: {}]  }
   0x1   :  { %v14_v0 = vld [vmem:[%s121_s0] sm:$0xf]  ;;  %v15_v1 = vld [vmem:[%s121_s0 + $0x4] sm:$0x7] }
   0x2   :  { %v16_v2 = vunpack.c.l.bf16 %v14_v0  ;;  %v17_v3 = vunpack.c.l.bf16 %v15_v1  ;;  %v71_v23 = vld [vmem:[%s122_s1] ss:$0 sm:$0xff] }
   0x3   :  { %v72_v25 = vld [vmem:[%s123_s2] ss:$0 sm:$0xff] }
   0x4   :  { %v19_v4 = vsel %vm18_vm0, %v16_v2, 0.0  ;;  %v23_v5 = vsel %vm22_vm1, %v17_v3, 0.0 }
   0x5   :  { %20 = vadd.xlane.f32.xlu0 %v19_v4 }
   0x9   :  { %24 = vadd.xlane.f32.xlu0 %v23_v5 }
  0x92   :  { %v21_v6 = vpop.xlane.xlu0 %20 }
  0x93   :  { %v27_v7 = vmul.f32 0.03125, %v21_v6 }
  0x95   :  { %v29_v8 = vsub.f32 %v16_v2, %v27_v7 }
  0x96   :  { %v25_v9 = vpop.xlane.xlu0 %24 }
  0x97   :  { %v28_v10 = vmul.f32 0.03125, %v25_v9  ;;  %v31_v11 = vmul.f32 %v29_v8, %v29_v8 }
  0x99   :  { %v30_v12 = vsub.f32 %v17_v3, %v28_v10  ;;  %v33_v13 = vsel %vm18_vm0, %v31_v11, 0.0 }
  0x9a   :  { %34 = vadd.xlane.f32.xlu1 %v33_v13 }
  0x9b   :  { %v32_v14 = vmul.f32 %v30_v12, %v30_v12 }
  0x9d   :  { %v36_v15 = vsel %vm22_vm1, %v32_v14, 0.0 }
  0x9e   :  { %37 = vadd.xlane.f32.xlu1 %v36_v15 }
 0x127   :  { %v35_v16 = vpop.xlane.xlu1 %34 }
 0x128   :  { %v39_v17 = vmul.f32 0.03125, %v35_v16 }
 0x12a   :  { %v41_v18 = vadd.f32 1e-12, %v39_v17 }
 0x12b   :  { %v38_v19 = vpop.xlane.xlu1 %37 }
 0x12c   :  { %73 = vrsqrt.f32 %v41_v18  ;;  %v40_v20 = vmul.f32 0.03125, %v38_v19 }
 0x12e   :  { %v42_v21 = vadd.f32 1e-12, %v40_v20 }
 0x130   :  { %75 = vrsqrt.f32 %v42_v21 }
 0x136   :  { %v74_v22 = vpop.eup %73 }
 0x137   :  { %v45_v24 = vmul.f32 %v74_v22, %v29_v8 }
 0x139   :  { %v54_v26 = vmul.f32 %v71_v23, %v45_v24 }
 0x13a   :  { %v76_v27 = vpop.eup %75 }
 0x13b   :  { %v63_v28 = vadd.f32 %v72_v25, %v54_v26  ;;  %v46_v29 = vmul.f32 %v76_v27, %v30_v12 }
 0x13d   :  { %65 = vst.msk [vmem:[%s124_s3] sm:$0xff] %vm18_vm0, %v63_v28  ;;  %v55_v30 = vmul.f32 %v71_v23, %v46_v29 }
 0x13f   :  { %v64_v31 = vadd.f32 %v72_v25, %v55_v30 }
 0x141   :  { %66 = vst.msk [vmem:[%s124_s3 + $0x8] sm:$0x3f] %vm22_vm1, %v64_v31 }

// kernel: transformer_encoder_forward.15
= control target key start
LH: loop header
LB: loop body
LE: loop exit
PB: predicated region body
PF: predicated region fallthrough
CT: control target
= control target key end

     0   :  { %vm56_vm0 = vcmask 1043456   ;;  %vm52_vm1 = vcmask 64512   ;;  %v633_v0 = vmov 0.0   ;;  %vm634_vm2 = vmmov 0   ;;  %s814_s3 = inlined_call_operand.vmem [shape: bf16[4,8,32], index: 3, kind: input, shape index: {}]   ;;  %s815_s0 = inlined_call_operand.vmem [shape: bf16[4,14,8], index: 0, kind: input, shape index: {}]   ;;  %s816_s1 = inlined_call_operand.vmem [shape: bf16[14,32], index: 1, kind: input, shape index: {}, may-alias: {1,11}]   ;;  %s817_s4 = inlined_call_operand.vmem [shape: f32[1,32], index: 4, kind: input, shape index: {}]   ;;  %s818_s7 = inlined_call_operand.vmem [shape: bf16[32,64], index: 7, kind: input, shape index: {}]   ;;  %s819_s9 = inlined_call_operand.vmem [shape: bf16[64,32], index: 9, kind: input, shape index: {}]   ;;  %s820_s5 = inlined_call_operand.vmem [shape: f32[1,32], index: 5, kind: input, shape index: {}]   ;;  %s821_s6 = inlined_call_operand.vmem [shape: f32[1,32], index: 6, kind: input, shape index: {}]   ;;  %s822_s2 = inlined_call_operand.vmem [shape: f32[14,1], index: 2, kind: input, shape index: {}]   ;;  %s823_s8 = inlined_call_operand.vmem [shape: f32[1,64], index: 8, kind: input, shape index: {}]   ;;  %s824_s10 = inlined_call_operand.vmem [shape: f32[1,32], index: 10, kind: input, shape index: {}]   ;;  %s825_s11 = inlined_call_operand.vmem [shape: bf16[14,32], index: 11, kind: output, shape index: {}, may-alias: {1,11}]  }
   0x1   :  { %570 = vmatprep.subr.bf16.mxu0 %v633_v0  ;;  %576 = vmatprep.subr.bf16.mxu1 %v633_v0  ;;  %v522_v1 = vld [vmem:[%s814_s3 + $0x4] sm:$0xf]  ;;  %v41_v2 = vld [vmem:[%s814_s3] sm:$0xf]  ;;  %v619_v5 = vld [vmem:[%s815_s0 + $0x8] sm:$0x7f]  }
   0x2   :  { %v58_v3 = vsel %vm56_vm0, %v522_v1, 0  ;;  %v110_v4 = vsel %vm56_vm0, %v41_v2, 0  ;;  %572 = vmatprep.mubr.msk.bf16.mxu0 %vm634_vm2, %v633_v0  ;;  %578 = vmatprep.mubr.msk.bf16.mxu1 %vm634_vm2, %v633_v0  ;;  %v620_v6 = vld [vmem:[%s815_s0] sm:$0x7f]   ;;  %v529_v7 = vld [vmem:[%s814_s3 + $0x8] sm:$0xf] }
   0x3   :  { %571 = vmatpush3.bf16.msra.mxu0 %v58_v3  ;;  %577 = vmatpush3.bf16.msra.mxu1 %v110_v4  ;;  %v534_v8 = vld [vmem:[%s814_s3 + $0xc] sm:$0xf]  ;;  %v167_v9 = vsel %vm56_vm0, %v529_v7, 0  ;;  %v621_v11 = vld [vmem:[%s815_s0 + $0x10] sm:$0x7f]   ;;  %vm286_vm3 = vcmask 261120  }
   0x4   :  { %582 = vmatprep.subr.bf16.mxu0 %v633_v0  ;;  %588 = vmatprep.subr.bf16.mxu1 %v633_v0  ;;  %v226_v10 = vsel %vm56_vm0, %v534_v8, 0  ;;  %v622_v12 = vld [vmem:[%s815_s0 + $0x18] sm:$0x7f]   ;;  %v271_v23 = vld [vmem:[%s816_s1] sm:$0xf]  ;;  %vm290_vm4 = vcmask 259072  }
   0x5   :  { %v272_v26 = vld [vmem:[%s816_s1 + $0x4] sm:$0x7]  ;;  %v273_v28 = vunpack.c.l.bf16 %v271_v23  ;;  %v537_v38 = vld [vmem:[%s817_s4] ss:$0 sm:$0xff]  ;;  %v624_v57 = vld [vmem:[%s818_s7 + $0x8] sm:$0xff]   ;;  %vm443_vm5 = vcmask 523264  }
   0x6   :  { %573 = vmatmul.mubr.msk.bf16.vlgmr.msra.gmra.mrb[0].mxu0 %vm52_vm1, %v619_v5  ;;  %579 = vmatmul.mubr.msk.bf16.vlgmr.msra.gmra.mrb[0].mxu1 %vm52_vm1, %v620_v6  ;;  %v274_v35 = vunpack.c.l.bf16 %v272_v26  ;;  %v623_v56 = vld [vmem:[%s818_s7] sm:$0xff]   ;;  %v626_v59 = vld [vmem:[%s819_s9 + $0x8] sm:$0xff]   ;;  %vm512_vm6 = vcmask 257024   ;;  %vm514_vm7 = vcmask 256000  }
   0x7   :  { %583 = vmatpush3.bf16.msra.mxu0 %v167_v9  ;;  %589 = vmatpush3.bf16.msra.mxu1 %v226_v10  ;;  %v625_v58 = vld [vmem:[%s819_s9] sm:$0xff]  }
   0x8   :  { %584 = vmatprep.mubr.msk.bf16.mxu0 %vm634_vm2, %v633_v0  ;;  %590 = vmatprep.mubr.msk.bf16.mxu1 %vm634_vm2, %v633_v0  ;;  %v538_v5 = vld [vmem:[%s820_s5] ss:$0 sm:$0xff] }
   0x9   :  { %594 = vmatprep.subr.bf16.mxu0 %v633_v0  ;;  %602 = vmatprep.subr.bf16.mxu1 %v633_v0  ;;  %v539_v9 = vld [vmem:[%s821_s6] ss:$0 sm:$0xff] }
   0xe   :  { %585 = vmatmul.mubr.msk.bf16.vlgmr.msra.gmra.mrb[4].mxu0 %vm52_vm1, %v621_v11  ;;  %591 = vmatmul.mubr.msk.bf16.vlgmr.msra.gmra.mrb[4].mxu1 %vm52_vm1, %v622_v12 }
   0xf   :  { %598 = vmatprep.mubr.msk.bf16.mxu0 %vm634_vm2, %v633_v0  ;;  %610 = vmatprep.mubr.msk.bf16.mxu1 %vm634_vm2, %v633_v0 }
  0x10   :  { %595 = vmatpush3.bf16.msra.mxu0 %v623_v56  ;;  %603 = vmatpush3.bf16.msra.mxu1 %v625_v58 }
  0x11   :  { %596 = vmatprep.subr.bf16.mxu0 %v633_v0  ;;  %604 = vmatprep.subr.bf16.mxu1 %v633_v0 }
  0x14   :  { %597 = vmatpush3.bf16.msra.mxu0 %v624_v57  ;;  %605 = vmatpush3.bf16.msra.mxu1 %v626_v59 }
  0x15   :  { %606 = vmatprep.subr.bf16.mxu1 %v633_v0 }
  0xd9   :  { %v94_v13 = vpop.f32.mrb[0].mxu0  ;;  %v146_v14 = vpop.f32.mrb[0].mxu1 }
  0xda   :  { %v147_v15 = vadd.f32 %v146_v14, %v94_v13  ;;  %v574_v16 = vpop.f32.mrb[1].mxu0  ;;  %v580_v17 = vpop.f32.mrb[1].mxu1  ;;  %v627_v14 = vld [vmem:[%s819_s9 + $0x10] sm:$0xff]  }
  0xdb   :  { %v97_v18 = vpop.f32.mrb[2].mxu0  ;;  %v149_v19 = vpop.f32.mrb[2].mxu1  ;;  %607 = vmatpush3.bf16.msra.mxu1 %v627_v14  ;;  %v635_v16 = vmov 0   ;;  %v490_v17 = vld [vmem:[%s822_s2] sm:$0xff] }
  0xdc   :  { %v150_v20 = vadd.f32 %v149_v19, %v97_v18  ;;  %v575_v21 = vpop.f32.mrb[3].mxu0  ;;  %v581_v22 = vpop.f32.mrb[3].mxu1  ;;  %608 = vmatprep.subr.bf16.mxu1 %v633_v0  ;;  %617 = vset.pattern.permute.xlu0 %v635_v16  ;;  %v491_v18 = vld [vmem:[%s822_s2 + $0x8] sm:$0x3f]  ;;  %v540_v0 = vld [vmem:[%s823_s8] ss:$0 sm:$0xff] }
  0xdd   :  { %618 = vset.pattern.permute.xlu1 %v635_v16 }
  0xe1   :  { %v203_v24 = vpop.f32.mrb[4].mxu0  ;;  %v262_v25 = vpop.f32.mrb[4].mxu1 }
  0xe2   :  { %v210_v27 = vadd.f32 %v203_v24, %v147_v15  ;;  %v586_v29 = vpop.f32.mrb[5].mxu0  ;;  %v592_v30 = vpop.f32.mrb[5].mxu1  ;;  %v628_v15 = vld [vmem:[%s819_s9 + $0x18] sm:$0xff]  }
  0xe3   :  { %v206_v31 = vpop.f32.mrb[6].mxu0  ;;  %v265_v32 = vpop.f32.mrb[6].mxu1  ;;  %609 = vmatpush3.bf16.msra.mxu1 %v628_v15 }
  0xe4   :  { %v269_v33 = vadd.f32 %v262_v25, %v210_v27  ;;  %v211_v34 = vadd.f32 %v206_v31, %v150_v20  ;;  %v587_v36 = vpop.f32.mrb[7].mxu0  ;;  %v593_v37 = vpop.f32.mrb[7].mxu1 }
  0xe6   :  { %v275_v39 = vadd.f32 %v273_v28, %v269_v33  ;;  %v270_v40 = vadd.f32 %v265_v32, %v211_v34  ;;  %v544_v28 = vld [vmem:[%s824_s10] ss:$0 sm:$0xff] }
  0xe8   :  { %v276_v41 = vadd.f32 %v274_v35, %v270_v40  ;;  %v755_v42 = vadd.f32 %v537_v38, %v275_v39 }
  0xea   :  { %v757_v43 = vadd.f32 %v537_v38, %v276_v41  ;;  %v287_v44 = vsel %vm286_vm3, %v755_v42, 0.0 }
  0xeb   :  { %288 = vadd.xlane.f32.xlu0 %v287_v44 }
  0xec   :  { %v291_v45 = vsel %vm290_vm4, %v757_v43, 0.0 }
  0xef   :  { %292 = vadd.xlane.f32.xlu0 %v291_v45 }
 0x105   :  { %494 = vperm.xlu0 %617, %v490_v17  }
 0x178   :  { %v289_v46 = vpop.xlane.xlu0 %288 }
 0x179   :  { %v295_v47 = vmul.f32 0.03125, %v289_v46 }
 0x17b   :  { %v297_v48 = vsub.f32 %v755_v42, %v295_v47 }
 0x17c   :  { %v293_v49 = vpop.xlane.xlu0 %292 }
 0x17d   :  { %v296_v50 = vmul.f32 0.03125, %v293_v49  ;;  %v299_v51 = vmul.f32 %v297_v48, %v297_v48 }
 0x17f   :  { %v298_v52 = vsub.f32 %v757_v43, %v296_v50  ;;  %v301_v53 = vsel %vm286_vm3, %v299_v51, 0.0 }
 0x180   :  { %302 = vadd.xlane.f32.xlu1 %v301_v53 }
 0x181   :  { %v300_v54 = vmul.f32 %v298_v52, %v298_v52 }
 0x183   :  { %v304_v55 = vsel %vm290_vm4, %v300_v54, 0.0 }
 0x184   :  { %305 = vadd.xlane.f32.xlu1 %v304_v55  ;;  %v495_v33 = vpop.permute.xlu0 %494 }
 0x195   :  { %499 = vperm.xlu1 %618, %v491_v18  }
 0x20d   :  { %v303_v60 = vpop.xlane.xlu1 %302 }
 0x20e   :  { %v307_v61 = vmul.f32 0.03125, %v303_v60 }
 0x210   :  { %v309_v62 = vadd.f32 1e-12, %v307_v61 }
 0x211   :  { %v306_v63 = vpop.xlane.xlu1 %305 }
 0x212   :  { %629 = vrsqrt.f32 %v309_v62  ;;  %v308_v1 = vmul.f32 0.03125, %v306_v63 }
 0x214   :  { %v310_v2 = vadd.f32 1e-12, %v308_v1 }
 0x215   :  { %v500_v37 = vpop.permute.xlu1 %499 }
 0x216   :  { %631 = vrsqrt.f32 %v310_v2 }
 0x21c   :  { %v630_v3 = vpop.eup %629 }
 0x21d   :  { %v313_v4 = vmul.f32 %v630_v3, %v297_v48 }
 0x21f   :  { %v322_v7 = vmul.f32 %v538_v5, %v313_v4 }
 0x220   :  { %v632_v6 = vpop.eup %631 }
 0x221   :  { %v314_v8 = vmul.f32 %v632_v6, %v298_v52  ;;  %v331_v11 = vadd.f32 %v539_v9, %v322_v7 }
 0x223   :  { %v323_v10 = vmul.f32 %v538_v5, %v314_v8 }
 0x225   :  { %v332_v12 = vadd.f32 %v539_v9, %v323_v10 }
 0x227   :  { %v333_v13 = vpack.c.bf16 %v332_v12, %v331_v11 }
 0x229   :  { %599 = vmatmul.mubr.msk.bf16.vlgmr.msra.gmra.mrb[8].mxu0 %vm286_vm3, %v333_v13 }
 0x2fc   :  { %v394_v19 = vpop.f32.mrb[8].mxu0 }
 0x2fd   :  { %v395_v20 = vadd.f32 %v540_v0, %v394_v19  ;;  %v600_v21 = vpop.f32.mrb[9].mxu0 }
 0x2fe   :  { %v397_v22 = vpop.f32.mrb[10].mxu0 }
 0x2ff   :  { %v398_v23 = vadd.f32 %v540_v0, %v397_v22  ;;  %v601_v24 = vpop.f32.mrb[11].mxu0  ;;  %v401_v25 = vmax.f32 %v395_v20, 0.0 }
 0x301   :  { %v402_v26 = vmax.f32 %v398_v23, 0.0 }
 0x303   :  { %v403_v27 = vpack.c.bf16 %v402_v26, %v401_v25 }
 0x305   :  { %611 = vmatmul.mubr.msk.bf16.vlgmr.msra.gmra.mrb[8].mxu1 %vm443_vm5, %v403_v27 }
 0x3d8   :  { %v481_v29 = vpop.f32.mrb[8].mxu1 }
 0x3d9   :  { %v482_v30 = vadd.f32 %v544_v28, %v481_v29  ;;  %v612_v31 = vpop.f32.mrb[9].mxu1 }
 0x3da   :  { %v484_v32 = vpop.f32.mrb[10].mxu1 }
 0x3db   :  { %v485_v34 = vadd.f32 %v544_v28, %v484_v32  ;;  %v613_v35 = vpop.f32.mrb[11].mxu1  ;;  %v488_v36 = vadd.f32 %v482_v30, %v755_v42 }
 0x3dd   :  { %v502_v38 = vmul.f32 %v495_v33, %v488_v36  ;;  %v489_v39 = vadd.f32 %v485_v34, %v757_v43 }
 0x3df   :  { %v552_v40 = vpack.c.bf16 %v502_v38, %v502_v38  ;;  %v503_v41 = vmul.f32 %v500_v37, %v489_v39 }
 0x3e1   :  { %513 = vst.msk [vmem:[%s825_s11] sm:$0xf] %vm512_vm6, %v552_v40  ;;  %v553_v44 = vpack.c.bf16 %v503_v41, %v503_v41 }
 0x3e3   :  { %515 = vst.msk [vmem:[%s825_s11 + $0x4] sm:$0x7] %vm514_vm7, %v553_v44 }

</bundles_post_ra>
